<compile_context>
chip_gen: v5e
topology: v5e:2x2
jax: 0.10.0
libtpu: 0.0.40
codegen_flags: <defaults>
</compile_context>

<pallas_src>
from functools import partial

import jax
import jax.numpy as jnp
from jax import lax
from jax.experimental import pallas as pl
from jax.experimental.pallas import tpu as pltpu

_BN_EPS = 1e-5
_LANE = 128


def _round_up(x, m):
    return ((x + m - 1) // m) * m


# ------------------------------- fused kernel ------------------------------- #

def _fused_ir_kernel(*refs, H, W, Ho, Wo, stride, row_tile, has_expand,
                     use_res, compute_dtype):
    """One batch element per grid step; all three conv stages fused.

    refs = (x, [w_exp, b1], w_dw, b2, w_proj, b3, out, pad_scratch)
      x        : (1, H, W, C1p)       input block (channels padded to 128)
      w_exp    : (C1p, CHp)           1x1 expand weight  (BN scale folded in)
      w_dw     : (3, 3, CHp)          depthwise weight   (BN scale folded in)
      w_proj   : (CHp, C2p)           1x1 project weight (BN scale folded in)
      b*       : (1, C)               folded BN biases (f32)
      out      : (1, Ho, Wo, C2p)
      pad_ref  : (stride*(row_tile-1)+3, W+2, CHp) VMEM scratch for the halo
    """
    if has_expand:
        (x_ref, w_exp_ref, b1_ref, w_dw_ref, b2_ref,
         w_proj_ref, b3_ref, o_ref, pad_ref) = refs
    else:
        (x_ref, w_dw_ref, b2_ref, w_proj_ref, b3_ref, o_ref, pad_ref) = refs

    # Hoisted weight/bias loads (re-used by every row chunk).
    if has_expand:
        w_exp = w_exp_ref[...].astype(compute_dtype)
        b1 = b1_ref[...]                                   # (1, CHp) f32
    w_dw = w_dw_ref[...]                                   # (3, 3, CHp) f32
    taps = [w_dw[i:i + 1, j:j + 1, :] for i in range(3) for j in range(3)]
    b2 = b2_ref[...]                                       # (1, CHp) f32
    w_proj = w_proj_ref[...].astype(compute_dtype)         # (CHp, C2p)
    b3 = b3_ref[...]                                       # (1, C2p) f32
    chp = w_dw.shape[-1]

    # Zero the scratch once: the side halo columns (0 and W+1) stay zero for
    # the whole kernel; interior columns are overwritten per chunk.
    pad_ref[...] = jnp.zeros_like(pad_ref)

    n_chunks = -(-Ho // row_tile)
    for ci in range(n_chunks):                      # static row-chunk loop
        r0 = ci * row_tile
        th = min(row_tile, Ho - r0)                 # output rows this chunk
        lo = stride * r0 - 1                        # input rows needed (halo)
        hi = stride * (r0 + th - 1) + 1
        lo_c, hi_c = max(lo, 0), min(hi, H - 1)
        pad_top, n_in = lo_c - lo, hi_c - lo_c + 1
        rows_read = stride * (th - 1) + 3           # scratch rows consumed

        # ---- 1x1 expansion conv (+ folded BN) + ReLU6, incl. halo rows ------
        x_rows = x_ref[0, lo_c:hi_c + 1, :, :]             # (n_in, W, C1p)
        if has_expand:
            e = jnp.dot(x_rows.reshape(n_in * W, -1).astype(compute_dtype),
                        w_exp, preferred_element_type=jnp.float32)
            e = jnp.clip(e + b1, 0.0, 6.0).reshape(n_in, W, chp)
        else:
            e = x_rows.astype(jnp.float32)

        # ---- build the zero halo inside VMEM (boundary rows only) -----------
        if pad_top > 0:                             # first chunk: top halo row
            pad_ref[0:pad_top, 1:1 + W, :] = jnp.zeros(
                (pad_top, W, chp), jnp.float32)
        bottom = rows_read - (pad_top + n_in)
        if bottom > 0:                              # last chunk: bottom halo
            pad_ref[pad_top + n_in:rows_read, 1:1 + W, :] = jnp.zeros(
                (bottom, W, chp), jnp.float32)
        pad_ref[pad_top:pad_top + n_in, 1:1 + W, :] = e

        # ---- 3x3 depthwise conv, stride fused (only output positions) -------
        acc = jnp.zeros((th, Wo, chp), jnp.float32)
        k = 0
        for dh in range(3):
            for dw in range(3):
                if stride == 1:
                    win = pad_ref[dh:dh + th, dw:dw + Wo, :]
                else:
                    win = pad_ref[pl.ds(dh, th, stride),
                                  pl.ds(dw, Wo, stride), :]
                acc = acc + win * taps[k]
                k += 1
        d = jnp.clip(acc + b2, 0.0, 6.0)                   # (th, Wo, CHp)

        # ---- 1x1 projection conv (+ folded BN) + optional fused residual ----
        p = jnp.dot(d.reshape(th * Wo, chp).astype(compute_dtype),
                    w_proj, preferred_element_type=jnp.float32) + b3
        if use_res:                                        # stride==1, c1==c2
            # residual rows are a subset of the already-loaded x_rows slice
            res = x_rows[r0 - lo_c:r0 - lo_c + th, :, :].astype(jnp.float32)
            p = p + res.reshape(th * Wo, -1)
        o_ref[0, r0:r0 + th, :, :] = p.reshape(th, Wo, -1).astype(o_ref.dtype)


# ------------------------------ module wrapper ------------------------------ #

def _fold_bn(gamma, beta, mean, var, eps=_BN_EPS):
    scale = gamma / jnp.sqrt(var + eps)
    bias = beta - mean * scale
    return scale, bias


def init_inverted_residual_params(key, c1, c2, expand_ratio):
    """Raw parameters in PyTorch-equivalent layouts + BN stats."""
    ch = int(round(c1 * expand_ratio))
    ks = jax.random.split(key, 6)

    def bn_params(k, c):
        k1, k2, k3, k4 = jax.random.split(k, 4)
        gamma = 1.0 + 0.1 * jax.random.normal(k1, (c,), jnp.float32)
        beta = 0.1 * jax.random.normal(k2, (c,), jnp.float32)
        mean = 0.1 * jax.random.normal(k3, (c,), jnp.float32)
        var = 0.5 + jnp.abs(jax.random.normal(k4, (c,), jnp.float32))
        return gamma, beta, mean, var

    raw = {"ch": ch, "expand_ratio": expand_ratio}
    if expand_ratio != 1:
        w = 0.2 * jax.random.normal(ks[0], (ch, c1, 1, 1), jnp.float32)
        raw["w_exp"] = jnp.transpose(w[:, :, 0, 0], (1, 0))     # (c1, ch)
        raw["bn1"] = bn_params(ks[1], ch)
    w = 0.2 * jax.random.normal(ks[2], (ch, 1, 3, 3), jnp.float32)
    raw["w_dw"] = jnp.transpose(w[:, 0, :, :], (1, 2, 0))       # (3, 3, ch)
    raw["bn2"] = bn_params(ks[3], ch)
    w = 0.2 * jax.random.normal(ks[4], (c2, ch, 1, 1), jnp.float32)
    raw["w_proj"] = jnp.transpose(w[:, :, 0, 0], (1, 0))        # (ch, c2)
    raw["bn3"] = bn_params(ks[5], c2)
    return raw


def prepare_fused_params(raw, c1, c2, stride):
    """Fold BN scales into weights, pad channels to a multiple of 128 lanes."""
    ch = raw["ch"]
    c1p, chp, c2p = (_round_up(c1, _LANE), _round_up(ch, _LANE),
                     _round_up(c2, _LANE))
    prep = {"c1": c1, "c2": c2, "ch": ch, "c1p": c1p, "chp": chp, "c2p": c2p,
            "stride": stride, "has_expand": raw["expand_ratio"] != 1}

    def pad2(w, r, c):
        return jnp.pad(w, ((0, r - w.shape[0]), (0, c - w.shape[1])))

    if prep["has_expand"]:
        s1, b1 = _fold_bn(*raw["bn1"])
        prep["w_exp"] = pad2(raw["w_exp"] * s1[None, :], c1p, chp)
        prep["b1"] = jnp.pad(b1, (0, chp - ch)).reshape(1, chp)
    s2, b2 = _fold_bn(*raw["bn2"])
    prep["w_dw"] = jnp.pad(raw["w_dw"] * s2[None, None, :],
                           ((0, 0), (0, 0), (0, chp - ch)))
    prep["b2"] = jnp.pad(b2, (0, chp - ch)).reshape(1, chp)
    s3, b3 = _fold_bn(*raw["bn3"])
    prep["w_proj"] = pad2(raw["w_proj"] * s3[None, :], chp, c2p)
    prep["b3"] = jnp.pad(b3, (0, c2p - c2)).reshape(1, c2p)
    return prep


def inverted_residual_forward(prep, x_nchw, *, row_tile=8,
                              compute_dtype=jnp.float32):
    """Matches InvertedResidual.forward; NCHW in / NCHW out like PyTorch."""
    N, _, H, W = x_nchw.shape
    c1, c2 = prep["c1"], prep["c2"]
    c1p, chp, c2p = prep["c1p"], prep["chp"], prep["c2p"]
    stride = prep["stride"]
    has_expand = prep["has_expand"]
    use_res = (stride == 1) and (c1 == c2)

    Ho = (H - 1) // stride + 1
    Wo = (W - 1) // stride + 1
    row_tile = min(row_tile, Ho)
    span = stride * (row_tile - 1) + 3          # rows of halo'd intermediate

    # layout: NCHW -> NHWC, channels zero-padded to 128-lane density.
    x_nhwc = jnp.transpose(x_nchw, (0, 2, 3, 1))
    if c1p != c1:
        x_nhwc = jnp.pad(x_nhwc, ((0, 0), (0, 0), (0, 0), (0, c1p - c1)))

    inputs = [x_nhwc]
    in_specs = [pl.BlockSpec((1, H, W, c1p), lambda n: (n, 0, 0, 0))]
    if has_expand:
        inputs += [prep["w_exp"], prep["b1"]]
        in_specs += [pl.BlockSpec((c1p, chp), lambda n: (0, 0)),
                     pl.BlockSpec((1, chp), lambda n: (0, 0))]
    inputs += [prep["w_dw"], prep["b2"], prep["w_proj"], prep["b3"]]
    in_specs += [pl.BlockSpec((3, 3, chp), lambda n: (0, 0, 0)),
                 pl.BlockSpec((1, chp), lambda n: (0, 0)),
                 pl.BlockSpec((chp, c2p), lambda n: (0, 0)),
                 pl.BlockSpec((1, c2p), lambda n: (0, 0))]

    kernel = partial(_fused_ir_kernel, H=H, W=W, Ho=Ho, Wo=Wo, stride=stride,
                     row_tile=row_tile, has_expand=has_expand, use_res=use_res,
                     compute_dtype=compute_dtype)

    y = pl.pallas_call(
        kernel,
        out_shape=jax.ShapeDtypeStruct((N, Ho, Wo, c2p), x_nchw.dtype),
        grid=(N,),
        in_specs=in_specs,
        out_specs=pl.BlockSpec((1, Ho, Wo, c2p), lambda n: (n, 0, 0, 0)),
        scratch_shapes=[pltpu.VMEM((span, W + 2, chp), jnp.float32)],
        compiler_params=pltpu.CompilerParams(
            dimension_semantics=("parallel",),          # megacore
            vmem_limit_bytes=64 * 1024 * 1024),
    )(*inputs)

    # drop channel padding, NHWC -> NCHW.
    return jnp.transpose(y[..., :c2], (0, 3, 1, 2))


# ------------------------------ pure-JAX reference -------------------------- #

def _bn_inf(x, gamma, beta, mean, var, eps=_BN_EPS):
    return (x - mean) / jnp.sqrt(var + eps) * gamma + beta


def _reference_forward(raw, x_nchw, c1, c2, stride):
    use_res = (stride == 1) and (c1 == c2)
    ch = raw["ch"]
    x = jnp.transpose(x_nchw, (0, 2, 3, 1))
    dn = ("NHWC", "HWIO", "NHWC")
    h = x
    if raw["expand_ratio"] != 1:
        w = raw["w_exp"].reshape(1, 1, c1, ch)
        h = lax.conv_general_dilated(h, w, (1, 1), ((0, 0), (0, 0)),
                                     dimension_numbers=dn)
        h = jnp.clip(_bn_inf(h, *raw["bn1"]), 0.0, 6.0)
    w = raw["w_dw"].reshape(3, 3, 1, ch)
    h = lax.conv_general_dilated(h, w, (stride, stride), ((1, 1), (1, 1)),
                                 dimension_numbers=dn, feature_group_count=ch)
    h = jnp.clip(_bn_inf(h, *raw["bn2"]), 0.0, 6.0)
    w = raw["w_proj"].reshape(1, 1, ch, c2)
    h = lax.conv_general_dilated(h, w, (1, 1), ((0, 0), (0, 0)),
                                 dimension_numbers=dn)
    h = _bn_inf(h, *raw["bn3"])
    if use_res:
        h = x + h
    return jnp.transpose(h, (0, 3, 1, 2))


# ---------------------------------- main ------------------------------------ #

if __name__ == "__main__":
    # InvertedResidual(c1=4, c2=4, s=1, expand_ratio=4) -> ch=16, residual used
    N, C1, C2, H, W = 2, 4, 4, 16, 16
    STRIDE, EXPAND = 1, 4

    key = jax.random.PRNGKey(0)
    k_x, k_p = jax.random.split(key)
    x = jax.random.normal(k_x, (N, C1, H, W), jnp.float32)

    raw = init_inverted_residual_params(k_p, C1, C2, EXPAND)
    prep = prepare_fused_params(raw, C1, C2, STRIDE)

    out = inverted_residual_forward(prep, x, row_tile=8,
                                    compute_dtype=jnp.float32)
    out = jax.block_until_ready(out)

    ref = jax.block_until_ready(_reference_forward(raw, x, C1, C2, STRIDE))
    assert out.shape == (N, C2, H, W), out.shape
    assert jnp.allclose(out, ref, atol=1e-4, rtol=1e-4), \
        float(jnp.max(jnp.abs(out - ref)))

    print("KERNEL_OK")
</pallas_src>

<mosaic_0001>
module attributes {stable_mosaic.version = 11 : i64} {
  func.func @_fused_ir_kernel(%arg0: i32, %arg1: memref<1x16x16x128xf32, #tpu.memory_space<vmem>>, %arg2: memref<128x128xf32, #tpu.memory_space<vmem>>, %arg3: memref<1x128xf32, #tpu.memory_space<vmem>>, %arg4: memref<3x3x128xf32, #tpu.memory_space<vmem>>, %arg5: memref<1x128xf32, #tpu.memory_space<vmem>>, %arg6: memref<128x128xf32, #tpu.memory_space<vmem>>, %arg7: memref<1x128xf32, #tpu.memory_space<vmem>>, %arg8: memref<1x16x16x128xf32, #tpu.memory_space<vmem>>, %arg9: memref<10x18x128xf32, #tpu.memory_space<vmem>>) attributes {dimension_semantics = [#tpu.dimension_semantics<parallel>], iteration_bounds = array<i64: 2>, scalar_prefetch = 0 : i64, scratch_operands = 1 : i64, tpu.core_type = #tpu.core_type<tc>, window_params = [{transform_indices = @transform_0, window_bounds = array<i64: 1, 16, 16, 128>}, {pipeline_mode = #tpu.pipeline_mode<synchronous>, transform_indices = @transform_1, window_bounds = array<i64: 128, 128>}, {pipeline_mode = #tpu.pipeline_mode<synchronous>, transform_indices = @transform_2, window_bounds = array<i64: 1, 128>}, {pipeline_mode = #tpu.pipeline_mode<synchronous>, transform_indices = @transform_3, window_bounds = array<i64: 3, 3, 128>}, {pipeline_mode = #tpu.pipeline_mode<synchronous>, transform_indices = @transform_4, window_bounds = array<i64: 1, 128>}, {pipeline_mode = #tpu.pipeline_mode<synchronous>, transform_indices = @transform_5, window_bounds = array<i64: 128, 128>}, {pipeline_mode = #tpu.pipeline_mode<synchronous>, transform_indices = @transform_6, window_bounds = array<i64: 1, 128>}, {transform_indices = @transform_7, window_bounds = array<i64: 1, 16, 16, 128>}]} {
    %c0 = arith.constant 0 : index
    %c0_0 = arith.constant 0 : index
    %0 = vector.load %arg2[%c0, %c0_0] : memref<128x128xf32, #tpu.memory_space<vmem>>, vector<128x128xf32>
    %c0_1 = arith.constant 0 : index
    %c0_2 = arith.constant 0 : index
    %1 = vector.load %arg3[%c0_1, %c0_2] : memref<1x128xf32, #tpu.memory_space<vmem>>, vector<1x128xf32>
    %c0_3 = arith.constant 0 : index
    %c0_4 = arith.constant 0 : index
    %c0_5 = arith.constant 0 : index
    %2 = vector.load %arg4[%c0_3, %c0_4, %c0_5] : memref<3x3x128xf32, #tpu.memory_space<vmem>>, vector<3x3x128xf32>
    %3 = vector.extract_strided_slice %2 {offsets = [0, 0, 0], sizes = [1, 1, 128], strides = [1, 1, 1]} : vector<3x3x128xf32> to vector<1x1x128xf32>
    %4 = vector.extract_strided_slice %2 {offsets = [0, 1, 0], sizes = [1, 1, 128], strides = [1, 1, 1]} : vector<3x3x128xf32> to vector<1x1x128xf32>
    %5 = vector.extract_strided_slice %2 {offsets = [0, 2, 0], sizes = [1, 1, 128], strides = [1, 1, 1]} : vector<3x3x128xf32> to vector<1x1x128xf32>
    %6 = vector.extract_strided_slice %2 {offsets = [1, 0, 0], sizes = [1, 1, 128], strides = [1, 1, 1]} : vector<3x3x128xf32> to vector<1x1x128xf32>
    %7 = vector.extract_strided_slice %2 {offsets = [1, 1, 0], sizes = [1, 1, 128], strides = [1, 1, 1]} : vector<3x3x128xf32> to vector<1x1x128xf32>
    %8 = vector.extract_strided_slice %2 {offsets = [1, 2, 0], sizes = [1, 1, 128], strides = [1, 1, 1]} : vector<3x3x128xf32> to vector<1x1x128xf32>
    %9 = vector.extract_strided_slice %2 {offsets = [2, 0, 0], sizes = [1, 1, 128], strides = [1, 1, 1]} : vector<3x3x128xf32> to vector<1x1x128xf32>
    %10 = vector.extract_strided_slice %2 {offsets = [2, 1, 0], sizes = [1, 1, 128], strides = [1, 1, 1]} : vector<3x3x128xf32> to vector<1x1x128xf32>
    %11 = vector.extract_strided_slice %2 {offsets = [2, 2, 0], sizes = [1, 1, 128], strides = [1, 1, 1]} : vector<3x3x128xf32> to vector<1x1x128xf32>
    %c0_6 = arith.constant 0 : index
    %c0_7 = arith.constant 0 : index
    %12 = vector.load %arg5[%c0_6, %c0_7] : memref<1x128xf32, #tpu.memory_space<vmem>>, vector<1x128xf32>
    %c0_8 = arith.constant 0 : index
    %c0_9 = arith.constant 0 : index
    %13 = vector.load %arg6[%c0_8, %c0_9] : memref<128x128xf32, #tpu.memory_space<vmem>>, vector<128x128xf32>
    %c0_10 = arith.constant 0 : index
    %c0_11 = arith.constant 0 : index
    %14 = vector.load %arg7[%c0_10, %c0_11] : memref<1x128xf32, #tpu.memory_space<vmem>>, vector<1x128xf32>
    %cst = arith.constant 0.000000e+00 : f32
    %15 = vector.broadcast %cst : f32 to vector<10x18x128xf32>
    %c0_12 = arith.constant 0 : index
    %c0_13 = arith.constant 0 : index
    %c0_14 = arith.constant 0 : index
    %16 = vector.load %arg9[%c0_12, %c0_13, %c0_14] : memref<10x18x128xf32, #tpu.memory_space<vmem>>, vector<10x18x128xf32>
    tpu.vector_store %arg9[%c0_12, %c0_13, %c0_14], %15 {strides = array<i32>} : memref<10x18x128xf32, #tpu.memory_space<vmem>>, vector<10x18x128xf32>,
    %c0_15 = arith.constant 0 : index
    %c0_16 = arith.constant 0 : index
    %c0_17 = arith.constant 0 : index
    %c0_18 = arith.constant 0 : index
    %17 = vector.load %arg1[%c0_15, %c0_16, %c0_17, %c0_18] : memref<1x16x16x128xf32, #tpu.memory_space<vmem>>, vector<1x9x16x128xf32>
    %18 = vector.shape_cast %17 : vector<1x9x16x128xf32> to vector<9x16x128xf32>
    %19 = vector.shape_cast %18 : vector<9x16x128xf32> to vector<144x128xf32>
    %cst_19 = arith.constant dense<0.000000e+00> : vector<144x128xf32>
    %20 = tpu.matmul %19, %0, %cst_19 {dimension_numbers = #tpu.dot_dimension_numbers<[1], [0], [0], [1], [0, 0, 1, 1], [], []>} : vector<144x128xf32>, vector<128x128xf32>, vector<144x128xf32> -> vector<144x128xf32>
    %21 = vector.broadcast %1 : vector<1x128xf32> to vector<144x128xf32>
    %22 = arith.addf %20, %21 : vector<144x128xf32>
    %cst_20 = arith.constant 0.000000e+00 : f32
    %cst_21 = arith.constant 6.000000e+00 : f32
    %23 = vector.broadcast %cst_20 : f32 to vector<144x128xf32>
    %24 = arith.maximumf %23, %22 : vector<144x128xf32>
    %25 = vector.broadcast %cst_21 : f32 to vector<144x128xf32>
    %26 = arith.minimumf %25, %24 : vector<144x128xf32>
    %27 = vector.shape_cast %26 : vector<144x128xf32> to vector<9x16x128xf32>
    %cst_22 = arith.constant 0.000000e+00 : f32
    %28 = vector.broadcast %cst_22 : f32 to vector<1x16x128xf32>
    %c0_23 = arith.constant 0 : index
    %c1 = arith.constant 1 : index
    %c0_24 = arith.constant 0 : index
    %29 = vector.load %arg9[%c0_23, %c1, %c0_24] : memref<10x18x128xf32, #tpu.memory_space<vmem>>, vector<1x16x128xf32>
    tpu.vector_store %arg9[%c0_23, %c1, %c0_24], %28 {strides = array<i32>} : memref<10x18x128xf32, #tpu.memory_space<vmem>>, vector<1x16x128xf32>,
    %c1_25 = arith.constant 1 : index
    %c1_26 = arith.constant 1 : index
    %c0_27 = arith.constant 0 : index
    %30 = vector.load %arg9[%c1_25, %c1_26, %c0_27] : memref<10x18x128xf32, #tpu.memory_space<vmem>>, vector<9x16x128xf32>
    tpu.vector_store %arg9[%c1_25, %c1_26, %c0_27], %27 {strides = array<i32>} : memref<10x18x128xf32, #tpu.memory_space<vmem>>, vector<9x16x128xf32>,
    %cst_28 = arith.constant 0.000000e+00 : f32
    %31 = vector.broadcast %cst_28 : f32 to vector<8x16x128xf32>
    %c0_29 = arith.constant 0 : index
    %c0_30 = arith.constant 0 : index
    %c0_31 = arith.constant 0 : index
    %32 = vector.load %arg9[%c0_29, %c0_30, %c0_31] : memref<10x18x128xf32, #tpu.memory_space<vmem>>, vector<8x16x128xf32>
    %33 = vector.broadcast %3 : vector<1x1x128xf32> to vector<8x16x128xf32>
    %34 = arith.mulf %32, %33 : vector<8x16x128xf32>
    %35 = arith.addf %31, %34 : vector<8x16x128xf32>
    %c0_32 = arith.constant 0 : index
    %c1_33 = arith.constant 1 : index
    %c0_34 = arith.constant 0 : index
    %36 = vector.load %arg9[%c0_32, %c1_33, %c0_34] : memref<10x18x128xf32, #tpu.memory_space<vmem>>, vector<8x16x128xf32>
    %37 = vector.broadcast %4 : vector<1x1x128xf32> to vector<8x16x128xf32>
    %38 = arith.mulf %36, %37 : vector<8x16x128xf32>
    %39 = arith.addf %35, %38 : vector<8x16x128xf32>
    %c0_35 = arith.constant 0 : index
    %c2 = arith.constant 2 : index
    %c0_36 = arith.constant 0 : index
    %40 = vector.load %arg9[%c0_35, %c2, %c0_36] : memref<10x18x128xf32, #tpu.memory_space<vmem>>, vector<8x16x128xf32>
    %41 = vector.broadcast %5 : vector<1x1x128xf32> to vector<8x16x128xf32>
    %42 = arith.mulf %40, %41 : vector<8x16x128xf32>
    %43 = arith.addf %39, %42 : vector<8x16x128xf32>
    %c1_37 = arith.constant 1 : index
    %c0_38 = arith.constant 0 : index
    %c0_39 = arith.constant 0 : index
    %44 = vector.load %arg9[%c1_37, %c0_38, %c0_39] : memref<10x18x128xf32, #tpu.memory_space<vmem>>, vector<8x16x128xf32>
    %45 = vector.broadcast %6 : vector<1x1x128xf32> to vector<8x16x128xf32>
    %46 = arith.mulf %44, %45 : vector<8x16x128xf32>
    %47 = arith.addf %43, %46 : vector<8x16x128xf32>
    %c1_40 = arith.constant 1 : index
    %c1_41 = arith.constant 1 : index
    %c0_42 = arith.constant 0 : index
    %48 = vector.load %arg9[%c1_40, %c1_41, %c0_42] : memref<10x18x128xf32, #tpu.memory_space<vmem>>, vector<8x16x128xf32>
    %49 = vector.broadcast %7 : vector<1x1x128xf32> to vector<8x16x128xf32>
    %50 = arith.mulf %48, %49 : vector<8x16x128xf32>
    %51 = arith.addf %47, %50 : vector<8x16x128xf32>
    %c1_43 = arith.constant 1 : index
    %c2_44 = arith.constant 2 : index
    %c0_45 = arith.constant 0 : index
    %52 = vector.load %arg9[%c1_43, %c2_44, %c0_45] : memref<10x18x128xf32, #tpu.memory_space<vmem>>, vector<8x16x128xf32>
    %53 = vector.broadcast %8 : vector<1x1x128xf32> to vector<8x16x128xf32>
    %54 = arith.mulf %52, %53 : vector<8x16x128xf32>
    %55 = arith.addf %51, %54 : vector<8x16x128xf32>
    %c2_46 = arith.constant 2 : index
    %c0_47 = arith.constant 0 : index
    %c0_48 = arith.constant 0 : index
    %56 = vector.load %arg9[%c2_46, %c0_47, %c0_48] : memref<10x18x128xf32, #tpu.memory_space<vmem>>, vector<8x16x128xf32>
    %57 = vector.broadcast %9 : vector<1x1x128xf32> to vector<8x16x128xf32>
    %58 = arith.mulf %56, %57 : vector<8x16x128xf32>
    %59 = arith.addf %55, %58 : vector<8x16x128xf32>
    %c2_49 = arith.constant 2 : index
    %c1_50 = arith.constant 1 : index
    %c0_51 = arith.constant 0 : index
    %60 = vector.load %arg9[%c2_49, %c1_50, %c0_51] : memref<10x18x128xf32, #tpu.memory_space<vmem>>, vector<8x16x128xf32>
    %61 = vector.broadcast %10 : vector<1x1x128xf32> to vector<8x16x128xf32>
    %62 = arith.mulf %60, %61 : vector<8x16x128xf32>
    %63 = arith.addf %59, %62 : vector<8x16x128xf32>
    %c2_52 = arith.constant 2 : index
    %c2_53 = arith.constant 2 : index
    %c0_54 = arith.constant 0 : index
    %64 = vector.load %arg9[%c2_52, %c2_53, %c0_54] : memref<10x18x128xf32, #tpu.memory_space<vmem>>, vector<8x16x128xf32>
    %65 = vector.broadcast %11 : vector<1x1x128xf32> to vector<8x16x128xf32>
    %66 = arith.mulf %64, %65 : vector<8x16x128xf32>
    %67 = arith.addf %63, %66 : vector<8x16x128xf32>
    %68 = vector.shape_cast %12 : vector<1x128xf32> to vector<1x1x128xf32>
    %69 = vector.broadcast %68 : vector<1x1x128xf32> to vector<8x16x128xf32>
    %70 = arith.addf %67, %69 : vector<8x16x128xf32>
    %cst_55 = arith.constant 0.000000e+00 : f32
    %cst_56 = arith.constant 6.000000e+00 : f32
    %71 = vector.broadcast %cst_55 : f32 to vector<8x16x128xf32>
    %72 = arith.maximumf %71, %70 : vector<8x16x128xf32>
    %73 = vector.broadcast %cst_56 : f32 to vector<8x16x128xf32>
    %74 = arith.minimumf %73, %72 : vector<8x16x128xf32>
    %75 = vector.shape_cast %74 : vector<8x16x128xf32> to vector<128x128xf32>
    %cst_57 = arith.constant dense<0.000000e+00> : vector<128x128xf32>
    %76 = tpu.matmul %75, %13, %cst_57 {dimension_numbers = #tpu.dot_dimension_numbers<[1], [0], [0], [1], [0, 0, 1, 1], [], []>} : vector<128x128xf32>, vector<128x128xf32>, vector<128x128xf32> -> vector<128x128xf32>
    %77 = vector.broadcast %14 : vector<1x128xf32> to vector<128x128xf32>
    %78 = arith.addf %76, %77 : vector<128x128xf32>
    %79 = vector.extract_strided_slice %18 {offsets = [0, 0, 0], sizes = [8, 16, 128], strides = [1, 1, 1]} : vector<9x16x128xf32> to vector<8x16x128xf32>
    %80 = vector.shape_cast %79 : vector<8x16x128xf32> to vector<128x128xf32>
    %81 = arith.addf %78, %80 : vector<128x128xf32>
    %82 = vector.shape_cast %81 : vector<128x128xf32> to vector<8x16x128xf32>
    %c0_58 = arith.constant 0 : index
    %c0_59 = arith.constant 0 : index
    %c0_60 = arith.constant 0 : index
    %c0_61 = arith.constant 0 : index
    %83 = vector.load %arg8[%c0_58, %c0_59, %c0_60, %c0_61] : memref<1x16x16x128xf32, #tpu.memory_space<vmem>>, vector<1x8x16x128xf32>
    %84 = vector.shape_cast %83 : vector<1x8x16x128xf32> to vector<8x16x128xf32>
    %85 = vector.shape_cast %82 : vector<8x16x128xf32> to vector<1x8x16x128xf32>
    tpu.vector_store %arg8[%c0_58, %c0_59, %c0_60, %c0_61], %85 {strides = array<i32>} : memref<1x16x16x128xf32, #tpu.memory_space<vmem>>, vector<1x8x16x128xf32>,
    %c0_62 = arith.constant 0 : index
    %c7 = arith.constant 7 : index
    %c0_63 = arith.constant 0 : index
    %c0_64 = arith.constant 0 : index
    %86 = vector.load %arg1[%c0_62, %c7, %c0_63, %c0_64] : memref<1x16x16x128xf32, #tpu.memory_space<vmem>>, vector<1x9x16x128xf32>
    %87 = vector.shape_cast %86 : vector<1x9x16x128xf32> to vector<9x16x128xf32>
    %88 = vector.shape_cast %87 : vector<9x16x128xf32> to vector<144x128xf32>
    %cst_65 = arith.constant dense<0.000000e+00> : vector<144x128xf32>
    %89 = tpu.matmul %88, %0, %cst_65 {dimension_numbers = #tpu.dot_dimension_numbers<[1], [0], [0], [1], [0, 0, 1, 1], [], []>} : vector<144x128xf32>, vector<128x128xf32>, vector<144x128xf32> -> vector<144x128xf32>
    %90 = vector.broadcast %1 : vector<1x128xf32> to vector<144x128xf32>
    %91 = arith.addf %89, %90 : vector<144x128xf32>
    %cst_66 = arith.constant 0.000000e+00 : f32
    %cst_67 = arith.constant 6.000000e+00 : f32
    %92 = vector.broadcast %cst_66 : f32 to vector<144x128xf32>
    %93 = arith.maximumf %92, %91 : vector<144x128xf32>
    %94 = vector.broadcast %cst_67 : f32 to vector<144x128xf32>
    %95 = arith.minimumf %94, %93 : vector<144x128xf32>
    %96 = vector.shape_cast %95 : vector<144x128xf32> to vector<9x16x128xf32>
    %cst_68 = arith.constant 0.000000e+00 : f32
    %97 = vector.broadcast %cst_68 : f32 to vector<1x16x128xf32>
    %c9 = arith.constant 9 : index
    %c1_69 = arith.constant 1 : index
    %c0_70 = arith.constant 0 : index
    %98 = vector.load %arg9[%c9, %c1_69, %c0_70] : memref<10x18x128xf32, #tpu.memory_space<vmem>>, vector<1x16x128xf32>
    tpu.vector_store %arg9[%c9, %c1_69, %c0_70], %97 {strides = array<i32>} : memref<10x18x128xf32, #tpu.memory_space<vmem>>, vector<1x16x128xf32>,
    %c0_71 = arith.constant 0 : index
    %c1_72 = arith.constant 1 : index
    %c0_73 = arith.constant 0 : index
    %99 = vector.load %arg9[%c0_71, %c1_72, %c0_73] : memref<10x18x128xf32, #tpu.memory_space<vmem>>, vector<9x16x128xf32>
    tpu.vector_store %arg9[%c0_71, %c1_72, %c0_73], %96 {strides = array<i32>} : memref<10x18x128xf32, #tpu.memory_space<vmem>>, vector<9x16x128xf32>,
    %cst_74 = arith.constant 0.000000e+00 : f32
    %100 = vector.broadcast %cst_74 : f32 to vector<8x16x128xf32>
    %c0_75 = arith.constant 0 : index
    %c0_76 = arith.constant 0 : index
    %c0_77 = arith.constant 0 : index
    %101 = vector.load %arg9[%c0_75, %c0_76, %c0_77] : memref<10x18x128xf32, #tpu.memory_space<vmem>>, vector<8x16x128xf32>
    %102 = vector.broadcast %3 : vector<1x1x128xf32> to vector<8x16x128xf32>
    %103 = arith.mulf %101, %102 : vector<8x16x128xf32>
    %104 = arith.addf %100, %103 : vector<8x16x128xf32>
    %c0_78 = arith.constant 0 : index
    %c1_79 = arith.constant 1 : index
    %c0_80 = arith.constant 0 : index
    %105 = vector.load %arg9[%c0_78, %c1_79, %c0_80] : memref<10x18x128xf32, #tpu.memory_space<vmem>>, vector<8x16x128xf32>
    %106 = vector.broadcast %4 : vector<1x1x128xf32> to vector<8x16x128xf32>
    %107 = arith.mulf %105, %106 : vector<8x16x128xf32>
    %108 = arith.addf %104, %107 : vector<8x16x128xf32>
    %c0_81 = arith.constant 0 : index
    %c2_82 = arith.constant 2 : index
    %c0_83 = arith.constant 0 : index
    %109 = vector.load %arg9[%c0_81, %c2_82, %c0_83] : memref<10x18x128xf32, #tpu.memory_space<vmem>>, vector<8x16x128xf32>
    %110 = vector.broadcast %5 : vector<1x1x128xf32> to vector<8x16x128xf32>
    %111 = arith.mulf %109, %110 : vector<8x16x128xf32>
    %112 = arith.addf %108, %111 : vector<8x16x128xf32>
    %c1_84 = arith.constant 1 : index
    %c0_85 = arith.constant 0 : index
    %c0_86 = arith.constant 0 : index
    %113 = vector.load %arg9[%c1_84, %c0_85, %c0_86] : memref<10x18x128xf32, #tpu.memory_space<vmem>>, vector<8x16x128xf32>
    %114 = vector.broadcast %6 : vector<1x1x128xf32> to vector<8x16x128xf32>
    %115 = arith.mulf %113, %114 : vector<8x16x128xf32>
    %116 = arith.addf %112, %115 : vector<8x16x128xf32>
    %c1_87 = arith.constant 1 : index
    %c1_88 = arith.constant 1 : index
    %c0_89 = arith.constant 0 : index
    %117 = vector.load %arg9[%c1_87, %c1_88, %c0_89] : memref<10x18x128xf32, #tpu.memory_space<vmem>>, vector<8x16x128xf32>
    %118 = vector.broadcast %7 : vector<1x1x128xf32> to vector<8x16x128xf32>
    %119 = arith.mulf %117, %118 : vector<8x16x128xf32>
    %120 = arith.addf %116, %119 : vector<8x16x128xf32>
    %c1_90 = arith.constant 1 : index
    %c2_91 = arith.constant 2 : index
    %c0_92 = arith.constant 0 : index
    %121 = vector.load %arg9[%c1_90, %c2_91, %c0_92] : memref<10x18x128xf32, #tpu.memory_space<vmem>>, vector<8x16x128xf32>
    %122 = vector.broadcast %8 : vector<1x1x128xf32> to vector<8x16x128xf32>
    %123 = arith.mulf %121, %122 : vector<8x16x128xf32>
    %124 = arith.addf %120, %123 : vector<8x16x128xf32>
    %c2_93 = arith.constant 2 : index
    %c0_94 = arith.constant 0 : index
    %c0_95 = arith.constant 0 : index
    %125 = vector.load %arg9[%c2_93, %c0_94, %c0_95] : memref<10x18x128xf32, #tpu.memory_space<vmem>>, vector<8x16x128xf32>
    %126 = vector.broadcast %9 : vector<1x1x128xf32> to vector<8x16x128xf32>
    %127 = arith.mulf %125, %126 : vector<8x16x128xf32>
    %128 = arith.addf %124, %127 : vector<8x16x128xf32>
    %c2_96 = arith.constant 2 : index
    %c1_97 = arith.constant 1 : index
    %c0_98 = arith.constant 0 : index
    %129 = vector.load %arg9[%c2_96, %c1_97, %c0_98] : memref<10x18x128xf32, #tpu.memory_space<vmem>>, vector<8x16x128xf32>
    %130 = vector.broadcast %10 : vector<1x1x128xf32> to vector<8x16x128xf32>
    %131 = arith.mulf %129, %130 : vector<8x16x128xf32>
    %132 = arith.addf %128, %131 : vector<8x16x128xf32>
    %c2_99 = arith.constant 2 : index
    %c2_100 = arith.constant 2 : index
    %c0_101 = arith.constant 0 : index
    %133 = vector.load %arg9[%c2_99, %c2_100, %c0_101] : memref<10x18x128xf32, #tpu.memory_space<vmem>>, vector<8x16x128xf32>
    %134 = vector.broadcast %11 : vector<1x1x128xf32> to vector<8x16x128xf32>
    %135 = arith.mulf %133, %134 : vector<8x16x128xf32>
    %136 = arith.addf %132, %135 : vector<8x16x128xf32>
    %137 = vector.shape_cast %12 : vector<1x128xf32> to vector<1x1x128xf32>
    %138 = vector.broadcast %137 : vector<1x1x128xf32> to vector<8x16x128xf32>
    %139 = arith.addf %136, %138 : vector<8x16x128xf32>
    %cst_102 = arith.constant 0.000000e+00 : f32
    %cst_103 = arith.constant 6.000000e+00 : f32
    %140 = vector.broadcast %cst_102 : f32 to vector<8x16x128xf32>
    %141 = arith.maximumf %140, %139 : vector<8x16x128xf32>
    %142 = vector.broadcast %cst_103 : f32 to vector<8x16x128xf32>
    %143 = arith.minimumf %142, %141 : vector<8x16x128xf32>
    %144 = vector.shape_cast %143 : vector<8x16x128xf32> to vector<128x128xf32>
    %cst_104 = arith.constant dense<0.000000e+00> : vector<128x128xf32>
    %145 = tpu.matmul %144, %13, %cst_104 {dimension_numbers = #tpu.dot_dimension_numbers<[1], [0], [0], [1], [0, 0, 1, 1], [], []>} : vector<128x128xf32>, vector<128x128xf32>, vector<128x128xf32> -> vector<128x128xf32>
    %146 = vector.broadcast %14 : vector<1x128xf32> to vector<128x128xf32>
    %147 = arith.addf %145, %146 : vector<128x128xf32>
    %148 = vector.extract_strided_slice %87 {offsets = [1, 0, 0], sizes = [8, 16, 128], strides = [1, 1, 1]} : vector<9x16x128xf32> to vector<8x16x128xf32>
    %149 = vector.shape_cast %148 : vector<8x16x128xf32> to vector<128x128xf32>
    %150 = arith.addf %147, %149 : vector<128x128xf32>
    %151 = vector.shape_cast %150 : vector<128x128xf32> to vector<8x16x128xf32>
    %c0_105 = arith.constant 0 : index
    %c8 = arith.constant 8 : index
    %c0_106 = arith.constant 0 : index
    %c0_107 = arith.constant 0 : index
    %152 = vector.load %arg8[%c0_105, %c8, %c0_106, %c0_107] : memref<1x16x16x128xf32, #tpu.memory_space<vmem>>, vector<1x8x16x128xf32>
    %153 = vector.shape_cast %152 : vector<1x8x16x128xf32> to vector<8x16x128xf32>
    %154 = vector.shape_cast %151 : vector<8x16x128xf32> to vector<1x8x16x128xf32>
    tpu.vector_store %arg8[%c0_105, %c8, %c0_106, %c0_107], %154 {strides = array<i32>} : memref<1x16x16x128xf32, #tpu.memory_space<vmem>>, vector<1x8x16x128xf32>,
    return
  }
  func.func @transform_0(%arg0: i32) -> (i32, i32, i32, i32) {
    %c0_i32 = arith.constant 0 : i32
    %c0_i32_0 = arith.constant 0 : i32
    %c0_i32_1 = arith.constant 0 : i32
    %c0_i32_2 = arith.constant 0 : i32
    return %arg0, %c0_i32, %c0_i32_0, %c0_i32_1 : i32, i32, i32, i32
  }
  func.func @transform_1(%arg0: i32) -> (i32, i32) {
    %c0_i32 = arith.constant 0 : i32
    %c0_i32_0 = arith.constant 0 : i32
    %c0_i32_1 = arith.constant 0 : i32
    return %c0_i32, %c0_i32_0 : i32, i32
  }
  func.func @transform_2(%arg0: i32) -> (i32, i32) {
    %c0_i32 = arith.constant 0 : i32
    %c0_i32_0 = arith.constant 0 : i32
    %c0_i32_1 = arith.constant 0 : i32
    return %c0_i32, %c0_i32_0 : i32, i32
  }
  func.func @transform_3(%arg0: i32) -> (i32, i32, i32) {
    %c0_i32 = arith.constant 0 : i32
    %c0_i32_0 = arith.constant 0 : i32
    %c0_i32_1 = arith.constant 0 : i32
    %c0_i32_2 = arith.constant 0 : i32
    return %c0_i32, %c0_i32_0, %c0_i32_1 : i32, i32, i32
  }
  func.func @transform_4(%arg0: i32) -> (i32, i32) {
    %c0_i32 = arith.constant 0 : i32
    %c0_i32_0 = arith.constant 0 : i32
    %c0_i32_1 = arith.constant 0 : i32
    return %c0_i32, %c0_i32_0 : i32, i32
  }
  func.func @transform_5(%arg0: i32) -> (i32, i32) {
    %c0_i32 = arith.constant 0 : i32
    %c0_i32_0 = arith.constant 0 : i32
    %c0_i32_1 = arith.constant 0 : i32
    return %c0_i32, %c0_i32_0 : i32, i32
  }
  func.func @transform_6(%arg0: i32) -> (i32, i32) {
    %c0_i32 = arith.constant 0 : i32
    %c0_i32_0 = arith.constant 0 : i32
    %c0_i32_1 = arith.constant 0 : i32
    return %c0_i32, %c0_i32_0 : i32, i32
  }
  func.func @transform_7(%arg0: i32) -> (i32, i32, i32, i32) {
    %c0_i32 = arith.constant 0 : i32
    %c0_i32_0 = arith.constant 0 : i32
    %c0_i32_1 = arith.constant 0 : i32
    %c0_i32_2 = arith.constant 0 : i32
    return %arg0, %c0_i32, %c0_i32_0, %c0_i32_1 : i32, i32, i32, i32
  }
}

</mosaic_0001>

<bundles_post_ra>
// kernel: tpu_custom_call.1
= control target key start
LH: loop header
LB: loop body
LE: loop exit
PB: predicated region body
PF: predicated region fallthrough
CT: control target
= control target key end

     0   :  { %s3618_s0 = inlined_call_operand.hbm [shape: f32[2,16,16,128], index: 0, kind: input, shape index: {}]   ;;  %s3619_s1 = inlined_call_operand.hbm [shape: f32[128,128], index: 1, kind: input, shape index: {}]   ;;  %s3620_s2 = inlined_call_operand.vmem [shape: f32[1,128], index: 2, kind: input, shape index: {}]   ;;  %s3621_s3 = inlined_call_operand.hbm [shape: f32[3,3,128], index: 3, kind: input, shape index: {}]   ;;  %s3622_s4 = inlined_call_operand.vmem [shape: f32[1,128], index: 4, kind: input, shape index: {}]   ;;  %s3623_s5 = inlined_call_operand.hbm [shape: f32[128,128], index: 5, kind: input, shape index: {}]   ;;  %s3624_s6 = inlined_call_operand.vmem [shape: f32[1,128], index: 6, kind: input, shape index: {}]   ;;  %s3625_s7 = inlined_call_operand.hbm [shape: f32[2,16,16,128], index: 7, kind: output, shape index: {}]  }
   0x1   :  { %3638 = sst [smem:[#allocation19_spill]] %s3619_s1 }
   0x2   :  { %12 = vsyncpa [#allocation4], 0 }
   0x3   :  { %14 = vsyncpa [#allocation4 + $0x1], 0 }
   0x4   :  { %15 = vsyncpa [#allocation7], 0 }
   0x5   :  { %16 = vsyncpa [#allocation10], 0 }
   0x6   :  { %17 = vsyncpa [#allocation5], 0 }
   0x7   :  { %19 = vsyncpa [#allocation5 + $0x1], 0  ;;  %s2425_s24 = smov 0   ;;  %s2427_s25 = smov 0  }
   0x8   :  { %s2429_s26 = smov 0   ;;  %s2431_s27 = smov 0  }
   0x9 LB: > { %s2446_s28 = sadd.s32 4294967295, %s2373_s27   ;;  %s2002_s29 = sadd.s32 4294967294, %s2373_s27   ;;  %s2373_s27 = sphi %s2431_s27, %s3661_s27   ;;  %s2369_s26 = sphi %s2429_s26, %s3660_s26   ;;  %s2365_s25 = sphi %s2427_s25, %s3659_s25   ;;  %s2361_s24 = sphi %s2425_s24, %s3658_s24  }
   0xa   : > { %p45_p0 = scmp.ne.s32.totalorder %s2365_s25, %s2361_s24  ;;  %p46_p1 = scmp.eq.s32.totalorder %s2446_s28, 0 }
   0xb   : > { %p195_p2 = scmp.eq.s32.totalorder %s2446_s28, 1  ;;  %p201_p3 = scmp.eq.s32.totalorder %s2002_s29, 1 }
   0xc   : > { %p2455_p4 = por %p46_p1, %p45_p0  ;;  %p2003_p5 = scmp.ge.s32.totalorder %s2373_s27, 1 }
   0xd   : > { %p2460_p6 = por %p201_p3, %p45_p0  ;;  %p208_p7 = scmp.lt.s32.totalorder %s2373_s27, 3 }
   0xe   : > { %s3641_s1 = sld [smem:[#allocation19_spill]]  ;;  %s2375_s13 = smov [#allocation6]  }
   0xf   : > { %p2468_p8 = pnand %p2003_p5, %p208_p7  ;;  %s221_s14 = sshll.u32 %s2375_s13, 4  ;;  %s222_s14 = int_to_ptr.vmem [resolvable:$true] %s221_s14 }
  0x10   : > { %s236_s18 = sshll.u32 %s3621_s3, 4  ;;  %s3626_s19 = smov 128   ;;  %s237_s18 = int_to_ptr.hbm [resolvable:$true] %s236_s18 }
  0x11   : > { %p2074_p9 = pneg %p2468_p8  ;;  %s3627_s20 = smov 8  }
  0x12   : > { %s2378_s21 = smov [#allocation8]   ;;  %s2379_s23 = smov 64  }
  0x13   : > { %p2476_p10 = pnand %p2074_p9, %p46_p1  ;;  %s238_s22 = sshll.u32 %s2378_s21, 4  ;;  %s239_s22 = int_to_ptr.vmem [resolvable:$true] %s238_s22 }
  0x14   : > { %s219_s11 = sshll.u32 %s3641_s1, 4  ;;  %s2380_s29 = smov 4   ;;  %s220_s11 = int_to_ptr.hbm [resolvable:$true] %s219_s11 }
  0x15   : > { %2077 = dma.hbm_to_vmem [thread:$0]  (!%p2476_p10), %s220_s11, 2048, %s222_s14, [#allocation7], %s3626_s19, %s3626_s19, %s3627_s20  }
  0x16   : > { %2080 = dma.hbm_to_vmem [thread:$0]  (!%p2476_p10), %s237_s18, 192, %s239_s22, [#allocation7], %s2379_s23, %s2379_s23, %s2380_s29  }
  0x17   : > { %s253_s13 = sshll.u32 %s3623_s5, 4  ;;  %s2381_s11 = smov [#allocation9]   ;;  %s254_s13 = int_to_ptr.hbm [resolvable:$true] %s253_s13 }
  0x18   : > { %s255_s14 = sshll.u32 %s2381_s11, 4  ;;  %s2500_s16 = sadd.s32 1, %s2373_s27   ;;  %s256_s14 = int_to_ptr.vmem [resolvable:$true] %s255_s14 }
  0x19   : > { %2083 = dma.hbm_to_vmem [thread:$0]  (!%p2476_p10), %s254_s13, 2048, %s256_s14, [#allocation10], %s3626_s19, %s3626_s19, %s3627_s20  }
  0x1a   : > { %s29_s17 = ssub.s32 %s2373_s27, %s2500_s16  ;;  %s32_s18 = sadd.s32 1, %s2369_s26 }
  0x1b   : > { %p30_p12 = scmp.eq.s32.totalorder %s29_s17, 0  ;;  %p39_p13 = scmp.ne.s32.totalorder %s2369_s26, %s2365_s25 }
  0x1c   : > { %p40_p0 = scmp.eq.s32.totalorder %s2373_s27, 0  ;;  %p2095_p5 = scmp.lt.s32.totalorder %s2373_s27, 2 }
  0x1d   : > { %s2509_s21 = scalar_select %p30_p12, %s2369_s26, %s32_s18  }
  0x1e   : > { %p2513_p3 = por %p195_p2, %p39_p13  ;;  %s272_s15 = sand.u32 1, %s2369_s26  }
  0x1f   : > { %s2056_s23 = sshll.u32 %s2373_s27, 8  ;;  %p41_p7 = por %p40_p0, %p39_p13 }
  0x20   : > { %s2008_s29 = sshll.u32 %s272_s15, 8  ;;  %s281_s13 = scalar_lea.hbm %s3618_s0, %s2056_s23 }
  0x21   : > { %s282_s11 = sshll.u32 %s281_s13, 4  ;;  %s276_s14 = scalar_lea.vmem [#allocation3], %s2008_s29  ;;  %s283_s11 = int_to_ptr.hbm [resolvable:$true] %s282_s11 }
  0x22   : > { %s284_s17 = sshll.u32 %s276_s14, 4  ;;  %p2523_p9 = pnand %p2095_p5, %p41_p7  ;;  %s285_s17 = int_to_ptr.vmem [resolvable:$true] %s284_s17 }
  0x23   : > { %s273_s19 = scalar_lea.sflag [#allocation4], %s272_s15  ;;  %s2269_s20 = sshra.s32 %s283_s11, 4  ;;  %s2270_s20 = int_to_ptr.hbm [resolvable:$true] %s2269_s20 }
  0x24   : > { %s2271_s1 = scalar_lea.hbm %s2270_s20, 256  ;;  %p2273_p10 = pneg %p2523_p9 }
  0x25   : > { %p2272_p2 = scmp.ne.s32.totalorder %s2270_s20, %s2271_s1  ;;  %s2276_s29 = scalar_lea.hbm %s3618_s0, 512 }
  0x26   : > { %p2277_p0 = scmp.lt.s32.totalorder %s2270_s20, %s3618_s0  ;;  %p2278_p5 = scmp.lt.s32.totalorder %s2276_s29, %s2271_s1 }
  0x27   : > { %p2274_p12 = pnand %p2273_p10, %p2272_p2 }
  0x28   : > { %p2279_p7 = por %p2278_p5, %p2277_p0 }
  0x29   : > { %p2275_p13 = pneg %p2274_p12 }
  0x2b   : > { %p2280_p11 = pnand %p2279_p7, %p2275_p13 }
  0x2d   : > { %2283 = shalt.err (!%p2280_p11)
}
  0x2e   : > { %s3646_s15 = smov 8   ;;  %s3647_s14 = smov 128  }
  0x2f   : > { %2087 = dma.hbm_to_vmem [thread:$0]  (!%p2523_p9), %s283_s11, 4096, %s285_s17, %s273_s19, %s3647_s14, %s3647_s14, %s3646_s15  }
  0x30   : > { %296 = sbr.rel (%p2468_p8) target bundleno = 584 (0x248), region = 48 }
  0x35   : > { %s2543_s23 = sand.u32 1, %s2365_s25  }
  0x36   : > { %s2012_s1 = sshll.u32 %s2543_s23, 8  ;;  %s299_s20 = scalar_lea.sflag [#allocation4], %s2543_s23 }
  0x37   : > { %s2549_s9 = scalar_lea.vmem [#allocation3], %s2012_s1 }
  0x38   : > { %2344 = dma.done.wait (%p2455_p4), %s299_s20, 4096  }
  0x39   : > { %2346 = vsyncadd (%p2455_p4), %s299_s20, 4294963200 }
  0x3a   : > { %2348 = dma.done.wait (%p46_p1), [#allocation7], 2240  }
  0x3b   : > { %2350 = vsyncadd (%p46_p1), [#allocation7], 4294965056 }
  0x3c   : > { %2352 = dma.done.wait (%p46_p1), [#allocation10], 2048  }
  0x3d   : > { %2354 = vsyncadd (%p46_p1), [#allocation10], 4294965248  ;;  %v364_v0 = vld [vmem:[#allocation6 + $0x78] sm:$0xff]  ;;  %v363_v1 = vld [vmem:[#allocation6 + $0x70] sm:$0xff]  ;;  %v3628_v40 = vmov 0.0   ;;  %s3448_s14 = scalar_lea.vmem [#allocation11], %s2012_s1 }
  0x3e   : > { %438 = vmatpush.msra.mxu0 %v364_v0  ;;  %1178 = vmatpush.msra.mxu2 %v364_v0  ;;  %v362_v2 = vld [vmem:[#allocation6 + $0x68] sm:$0xff]  ;;  %v361_v3 = vld [vmem:[#allocation6 + $0x60] sm:$0xff]  ;;  %v360_v4 = vld [vmem:[#allocation6 + $0x58] sm:$0xff]  ;;  %390 = vst [vmem:[#allocation2 + $0x18] sm:$0xff] %v3628_v40  ;;  %s2057_s1 = sshll.u32 %s2446_s28, 8  ;;  %s1897_s19 = sshll.u32 %s3448_s14, 4  ;;  %s1898_s19 = int_to_ptr.vmem [resolvable:$true] %s1897_s19 }
  0x3f   : > { %v359_v5 = vld [vmem:[#allocation6 + $0x50] sm:$0xff]  ;;  %v358_v6 = vld [vmem:[#allocation6 + $0x48] sm:$0xff]  ;;  %v357_v7 = vld [vmem:[#allocation6 + $0x40] sm:$0xff]  ;;  %391 = vst [vmem:[#allocation2 + $0x20] sm:$0xff] %v3628_v40  ;;  %s1896_s12 = scalar_lea.hbm %s3625_s7, %s2057_s1  ;;  %s1885_s17 = scalar_lea.sflag [#allocation5], %s2543_s23 }
  0x40   : > { %439 = vmatpush.msra.mxu0 %v363_v1  ;;  %1179 = vmatpush.msra.mxu2 %v363_v1  ;;  %v356_v8 = vld [vmem:[#allocation6 + $0x38] sm:$0xff]  ;;  %v355_v9 = vld [vmem:[#allocation6 + $0x30] sm:$0xff]  ;;  %v354_v10 = vld [vmem:[#allocation6 + $0x28] sm:$0xff]  ;;  %387 = vst [vmem:[#allocation2] sm:$0xff] %v3628_v40  ;;  %s1899_s11 = sshll.u32 %s1896_s12, 4  ;;  %s2319_s13 = scalar_lea.hbm %s3625_s7, 512  ;;  %s1900_s11 = int_to_ptr.hbm [resolvable:$true] %s1899_s11 }
  0x41   : > { %v353_v11 = vld [vmem:[#allocation6 + $0x20] sm:$0xff]  ;;  %v352_v12 = vld [vmem:[#allocation6 + $0x18] sm:$0xff]  ;;  %v351_v13 = vld [vmem:[#allocation6 + $0x10] sm:$0xff]  ;;  %388 = vst [vmem:[#allocation2 + $0x8] sm:$0xff] %v3628_v40  ;;  %s2313_s28 = sshra.s32 %s1900_s11, 4  ;;  %s2314_s28 = int_to_ptr.hbm [resolvable:$true] %s2313_s28 }
  0x42   : > { %440 = vmatpush.msra.mxu0 %v362_v2  ;;  %1180 = vmatpush.msra.mxu2 %v362_v2  ;;  %v350_v14 = vld [vmem:[#allocation6 + $0x8] sm:$0xff]  ;;  %v349_v15 = vld [vmem:[#allocation6] sm:$0xff]  ;;  %v2565_v17 = vld [vmem:[%s2549_s9 + $0x70] sm:$0xff]  ;;  %389 = vst [vmem:[#allocation2 + $0x10] sm:$0x3] %v3628_v40  ;;  %s2315_s18 = scalar_lea.hbm %s2314_s28, 256  ;;  %p2320_p11 = scmp.lt.s32.totalorder %s2314_s28, %s3625_s7 }
  0x43   : > { %v417_v16 = vld [vmem:[%s2549_s9] sm:$0xff]  ;;  %v418_v18 = vld [vmem:[%s2549_s9 + $0x8] sm:$0xff]  ;;  %v2570_v19 = vld [vmem:[%s2549_s9 + $0x78] sm:$0xff]  ;;  %392 = vst [vmem:[#allocation2 + $0x28] sm:$0x3] %v3628_v40  ;;  %p2316_p1 = scmp.ne.s32.totalorder %s2314_s28, %s2315_s18  ;;  %p2321_p9 = scmp.lt.s32.totalorder %s2319_s13, %s2315_s18 }
  0x44   : > { %441 = vmatpush.msra.mxu0 %v361_v3  ;;  %1181 = vmatpush.msra.mxu2 %v361_v3  ;;  %v419_v20 = vld [vmem:[%s2549_s9 + $0x10] sm:$0xff]  ;;  %v2575_v21 = vld [vmem:[%s2549_s9 + $0x80] sm:$0xff]  ;;  %v420_v22 = vld [vmem:[%s2549_s9 + $0x18] sm:$0xff]  ;;  %393 = vst [vmem:[#allocation2 + $0x30] sm:$0xff] %v3628_v40 }
  0x45   : > { %v2580_v23 = vld [vmem:[%s2549_s9 + $0x88] sm:$0xff]  ;;  %v421_v24 = vld [vmem:[%s2549_s9 + $0x20] sm:$0xff]  ;;  %v2021_v25 = vld [vmem:[%s2549_s9 + $0x90] sm:$0xff]  ;;  %394 = vst [vmem:[#allocation2 + $0x38] sm:$0xff] %v3628_v40  ;;  %p2317_p4 = pnand %p2316_p1, %p2513_p3  ;;  %p2322_p2 = por %p2321_p9, %p2320_p11 }
  0x46   : > { %442 = vmatpush.msra.mxu0 %v360_v4  ;;  %1182 = vmatpush.msra.mxu2 %v360_v4  ;;  %v422_v26 = vld [vmem:[%s2549_s9 + $0x28] sm:$0xff]  ;;  %v2022_v27 = vld [vmem:[%s2549_s9 + $0x98] sm:$0xff]  ;;  %v423_v28 = vld [vmem:[%s2549_s9 + $0x30] sm:$0xff]  ;;  %395 = vst [vmem:[#allocation2 + $0x40] sm:$0x3] %v3628_v40 }
  0x47   : > { %v2023_v29 = vld [vmem:[%s2549_s9 + $0xa0] sm:$0xff]  ;;  %v424_v30 = vld [vmem:[%s2549_s9 + $0x38] sm:$0xff]  ;;  %v2024_v31 = vld [vmem:[%s2549_s9 + $0xa8] sm:$0xff]  ;;  %396 = vst [vmem:[#allocation2 + $0x48] sm:$0xff] %v3628_v40  ;;  %p2318_p8 = pneg %p2317_p4 }
  0x48   : > { %443 = vmatpush.msra.mxu0 %v359_v5  ;;  %1183 = vmatpush.msra.mxu2 %v359_v5  ;;  %v425_v32 = vld [vmem:[%s2549_s9 + $0x40] sm:$0xff]  ;;  %v2025_v33 = vld [vmem:[%s2549_s9 + $0xb0] sm:$0xff]  ;;  %v426_v34 = vld [vmem:[%s2549_s9 + $0x48] sm:$0xff]  ;;  %397 = vst [vmem:[#allocation2 + $0x50] sm:$0xff] %v3628_v40 }
  0x49   : > { %v2026_v35 = vld [vmem:[%s2549_s9 + $0xb8] sm:$0xff]  ;;  %v427_v36 = vld [vmem:[%s2549_s9 + $0x50] sm:$0xff]  ;;  %v2027_v37 = vld [vmem:[%s2549_s9 + $0xc0] sm:$0xff]  ;;  %398 = vst [vmem:[#allocation2 + $0x58] sm:$0x3] %v3628_v40  ;;  %p2323_p10 = pnand %p2322_p2, %p2318_p8 }
  0x4a   : > { %444 = vmatpush.msra.mxu0 %v358_v6  ;;  %1184 = vmatpush.msra.mxu2 %v358_v6  ;;  %v428_v38 = vld [vmem:[%s2549_s9 + $0x58] sm:$0xff]  ;;  %v2028_v39 = vld [vmem:[%s2549_s9 + $0xc8] sm:$0xff]  ;;  %v429_v41 = vld [vmem:[%s2549_s9 + $0x60] sm:$0xff]  ;;  %399 = vst [vmem:[#allocation2 + $0x60] sm:$0xff] %v3628_v40 }
  0x4b   : > { %v2029_v42 = vld [vmem:[%s2549_s9 + $0xd0] sm:$0xff]  ;;  %v430_v43 = vld [vmem:[%s2549_s9 + $0x68] sm:$0xff]  ;;  %v2030_v44 = vld [vmem:[%s2549_s9 + $0xd8] sm:$0xff]  ;;  %400 = vst [vmem:[#allocation2 + $0x68] sm:$0xff] %v3628_v40 }
  0x4c   : > { %445 = vmatpush.msra.mxu0 %v357_v7  ;;  %1185 = vmatpush.msra.mxu2 %v357_v7  ;;  %401 = vst [vmem:[#allocation2 + $0x70] sm:$0x3] %v3628_v40  ;;  %v2031_v45 = vld [vmem:[%s2549_s9 + $0xe0] sm:$0xff]  ;;  %v383_v48 = vld [vmem:[#allocation9 + $0x68] sm:$0xff]  ;;  %v382_v49 = vld [vmem:[#allocation9 + $0x60] sm:$0xff] }
  0x4d   : > { %402 = vst [vmem:[#allocation2 + $0x78] sm:$0xff] %v3628_v40  ;;  %v385_v46 = vld [vmem:[#allocation9 + $0x78] sm:$0xff]  ;;  %v384_v47 = vld [vmem:[#allocation9 + $0x70] sm:$0xff]  ;;  %v2642_v53 = vld [vmem:[%s3620_s2] ss:$0 sm:$0xff] }
  0x4e   : > { %446 = vmatpush.msra.mxu0 %v356_v8  ;;  %1186 = vmatpush.msra.mxu2 %v356_v8  ;;  %403 = vst [vmem:[#allocation2 + $0x80] sm:$0xff] %v3628_v40  ;;  %v2032_v50 = vld [vmem:[%s2549_s9 + $0xe8] sm:$0xff]  ;;  %v380_v52 = vld [vmem:[#allocation9 + $0x50] sm:$0xff]  ;;  %v379_v54 = vld [vmem:[#allocation9 + $0x48] sm:$0xff] }
  0x4f   : > { %404 = vst [vmem:[#allocation2 + $0x88] sm:$0x3] %v3628_v40  ;;  %1062 = vmatpush.msra.mxu1 %v385_v46  ;;  %1786 = vmatpush.msra.mxu3 %v385_v46  ;;  %v381_v51 = vld [vmem:[#allocation9 + $0x58] sm:$0xff]  ;;  %v378_v55 = vld [vmem:[#allocation9 + $0x40] sm:$0xff]  ;;  %v376_v61 = vld [vmem:[#allocation9 + $0x30] sm:$0xff] }
  0x50   : > { %447 = vmatpush.msra.mxu0 %v355_v9  ;;  %1187 = vmatpush.msra.mxu2 %v355_v9  ;;  %405 = vst [vmem:[#allocation2 + $0x90] sm:$0xff] %v3628_v40  ;;  %v2033_v57 = vld [vmem:[%s2549_s9 + $0xf0] sm:$0xff]  ;;  %v377_v59 = vld [vmem:[#allocation9 + $0x38] sm:$0xff]  ;;  %v366_v0 = vld [vmem:[#allocation8] sm:$0x7] }
  0x51   : > { %406 = vst [vmem:[#allocation2 + $0x98] sm:$0xff] %v3628_v40  ;;  %1063 = vmatpush.msra.mxu1 %v384_v47  ;;  %1787 = vmatpush.msra.mxu3 %v384_v47  ;;  %v375_v63 = vld [vmem:[#allocation9 + $0x28] sm:$0xff]  ;;  %v374_v3 = vld [vmem:[#allocation9 + $0x20] sm:$0xff]  ;;  %v2652_v6 = vperm.slane %v366_v0, 0  ;;  %v2654_v7 = vperm.slane %v366_v0, 1 }
  0x52   : > { %448 = vmatpush.msra.mxu0 %v354_v10  ;;  %1188 = vmatpush.msra.mxu2 %v354_v10  ;;  %407 = vst [vmem:[#allocation2 + $0xa0] sm:$0x3] %v3628_v40  ;;  %v2034_v5 = vld [vmem:[%s2549_s9 + $0xf8] sm:$0xff]  ;;  %v373_v10 = vld [vmem:[#allocation9 + $0x18] sm:$0xff] }
  0x53   : > { %408 = vst [vmem:[#allocation2 + $0xa8] sm:$0xff] %v3628_v40  ;;  %1064 = vmatpush.msra.mxu1 %v383_v48  ;;  %1788 = vmatpush.msra.mxu3 %v383_v48 }
  0x54   : > { %449 = vmatpush.msra.mxu0 %v353_v11  ;;  %1189 = vmatpush.msra.mxu2 %v353_v11  ;;  %409 = vst [vmem:[#allocation2 + $0xb0] sm:$0xff] %v3628_v40 }
  0x55   : > { %410 = vst [vmem:[#allocation2 + $0xb8] sm:$0x3] %v3628_v40  ;;  %1065 = vmatpush.msra.mxu1 %v382_v49  ;;  %1789 = vmatpush.msra.mxu3 %v382_v49 }
  0x56   : > { %450 = vmatpush.msra.mxu0 %v352_v12  ;;  %1190 = vmatpush.msra.mxu2 %v352_v12  ;;  %411 = vst [vmem:[#allocation2 + $0xc0] sm:$0xff] %v3628_v40 }
  0x57   : > { %412 = vst [vmem:[#allocation2 + $0xc8] sm:$0xff] %v3628_v40  ;;  %1066 = vmatpush.msra.mxu1 %v381_v51  ;;  %1790 = vmatpush.msra.mxu3 %v381_v51 }
  0x58   : > { %451 = vmatpush.msra.mxu0 %v351_v13  ;;  %1191 = vmatpush.msra.mxu2 %v351_v13  ;;  %413 = vst [vmem:[#allocation2 + $0xd0] sm:$0x3] %v3628_v40 }
  0x59   : > { %414 = vst [vmem:[#allocation2 + $0xd8] sm:$0xff] %v3628_v40  ;;  %1067 = vmatpush.msra.mxu1 %v380_v52  ;;  %1791 = vmatpush.msra.mxu3 %v380_v52 }
  0x5a   : > { %452 = vmatpush.msra.mxu0 %v350_v14  ;;  %1192 = vmatpush.msra.mxu2 %v350_v14  ;;  %415 = vst [vmem:[#allocation2 + $0xe0] sm:$0xff] %v3628_v40 }
  0x5b   : > { %416 = vst [vmem:[#allocation2 + $0xe8] sm:$0x3] %v3628_v40  ;;  %1068 = vmatpush.msra.mxu1 %v379_v54  ;;  %1792 = vmatpush.msra.mxu3 %v379_v54 }
  0x5c   : > { %453 = vmatpush.msra.mxu0 %v349_v15  ;;  %1193 = vmatpush.msra.mxu2 %v349_v15  ;;  %545 = vst [vmem:[#allocation2 + $0x1] sm:$0xff] %v3628_v40 }
  0x5d   : > { %454 = vmatmul.f32.vlgmr.msra.gmra.mxu0 %v417_v16  ;;  %1194 = vmatmul.f32.vlgmr.msra.gmra.mxu2 %v2565_v17  ;;  %546 = vst [vmem:[#allocation2 + $0x9] sm:$0xff] %v3628_v40  ;;  %v372_v16 = vld [vmem:[#allocation9 + $0x10] sm:$0xff] }
  0x5e   : > { %1069 = vmatpush.msra.mxu1 %v378_v55  ;;  %1793 = vmatpush.msra.mxu3 %v378_v55 }
  0x60   : > { %1070 = vmatpush.msra.mxu1 %v377_v59  ;;  %1794 = vmatpush.msra.mxu3 %v377_v59 }
  0x62   : > { %1071 = vmatpush.msra.mxu1 %v376_v61  ;;  %1795 = vmatpush.msra.mxu3 %v376_v61 }
  0x63   : > { %v566_v11 = vld [vmem:[#allocation2] sm:$0xff] }
  0x64   : > { %1072 = vmatpush.msra.mxu1 %v375_v63  ;;  %1796 = vmatpush.msra.mxu3 %v375_v63  ;;  %v664_v12 = vld [vmem:[#allocation2 + $0x2] sm:$0xff] }
  0x65   : > { %457 = vmatmul.f32.gmra.mxu0 %v418_v18  ;;  %1197 = vmatmul.f32.gmra.mxu2 %v2570_v19  ;;  %v567_v13 = vld [vmem:[#allocation2 + $0x8] sm:$0xff]  ;;  %v632_v18 = vmul.f32 0.0, %v2654_v7 }
  0x66   : > { %1073 = vmatpush.msra.mxu1 %v374_v3  ;;  %1797 = vmatpush.msra.mxu3 %v374_v3 }
  0x68   : > { %1074 = vmatpush.msra.mxu1 %v373_v10  ;;  %1798 = vmatpush.msra.mxu3 %v373_v10 }
  0x6a   : > { %1075 = vmatpush.msra.mxu1 %v372_v16  ;;  %1799 = vmatpush.msra.mxu3 %v372_v16 }
  0x6d   : > { %460 = vmatmul.f32.gmra.mxu0 %v419_v20  ;;  %1200 = vmatmul.f32.gmra.mxu2 %v2575_v21 }
  0x75   : > { %463 = vmatmul.f32.gmra.mxu0 %v420_v22  ;;  %1203 = vmatmul.f32.gmra.mxu2 %v2580_v23  ;;  %v367_v22 = vld [vmem:[#allocation8 + $0x4] sm:$0x7] }
  0x76   : > { %v2672_v47 = vperm.slane %v367_v22, 2 }
  0x7d   : > { %466 = vmatmul.f32.gmra.mxu0 %v421_v24  ;;  %1206 = vmatmul.f32.gmra.mxu2 %v2021_v25  ;;  %v584_v25 = vmul.f32 %v2652_v6, %v567_v13 }
  0x85   : > { %469 = vmatmul.f32.gmra.mxu0 %v422_v26  ;;  %1209 = vmatmul.f32.gmra.mxu2 %v2022_v27  ;;  %v370_v26 = vld [vmem:[#allocation9] sm:$0xff]  ;;  %v665_v27 = vld [vmem:[#allocation2 + $0xa] sm:$0xff] }
  0x8d   : > { %472 = vmatmul.f32.gmra.mxu0 %v423_v28  ;;  %1212 = vmatmul.f32.gmra.mxu2 %v2023_v29 }
  0x95   : > { %475 = vmatmul.f32.gmra.mxu0 %v424_v30  ;;  %1215 = vmatmul.f32.gmra.mxu2 %v2024_v31  ;;  %v2665_v31 = vperm.slane %v367_v22, 0 }
  0x9d   : > { %478 = vmatmul.f32.gmra.mxu0 %v425_v32  ;;  %1218 = vmatmul.f32.gmra.mxu2 %v2025_v33 }
  0xa5   : > { %481 = vmatmul.f32.gmra.mxu0 %v426_v34  ;;  %1221 = vmatmul.f32.gmra.mxu2 %v2026_v35  ;;  %v649_v35 = vadd.f32 %v632_v18, %v584_v25 }
  0xad   : > { %484 = vmatmul.f32.gmra.mxu0 %v427_v36  ;;  %1224 = vmatmul.f32.gmra.mxu2 %v2027_v37 }
  0xb5   : > { %487 = vmatmul.f32.gmra.mxu0 %v428_v38  ;;  %1227 = vmatmul.f32.gmra.mxu2 %v2028_v39 }
  0xbd   : > { %490 = vmatmul.f32.gmra.mxu0 %v429_v41  ;;  %1230 = vmatmul.f32.gmra.mxu2 %v2029_v42  ;;  %v2670_v42 = vperm.slane %v367_v22, 1 }
  0xc5   : > { %493 = vmatmul.f32.gmra.mxu0 %v430_v43  ;;  %1233 = vmatmul.f32.gmra.mxu2 %v2030_v44  ;;  %v368_v44 = vld [vmem:[#allocation8 + $0x8] sm:$0x7] }
  0xc6   : > { %v2683_v59 = vperm.slane %v368_v44, 1 }
  0xcd   : > { %496 = vmatmul.f32.gmra.mxu0 %v2565_v17  ;;  %1236 = vmatmul.f32.gmra.mxu2 %v2031_v45  ;;  %v583_v17 = vmul.f32 %v2652_v6, %v566_v11 }
  0xcf   : > { %v648_v29 = vadd.f32 %v632_v18, %v583_v17 }
  0xd5   : > { %499 = vmatmul.f32.gmra.mxu0 %v2570_v19  ;;  %1239 = vmatmul.f32.gmra.mxu2 %v2032_v50  ;;  %v2660_v19 = vperm.slane %v366_v0, 2  ;;  %v2686_v0 = vperm.slane %v368_v44, 2 }
  0xd7   : > { %v681_v30 = vmul.f32 %v2660_v19, %v664_v12  ;;  %v682_v36 = vmul.f32 %v2660_v19, %v665_v27 }
  0xd9   : > { %v697_v39 = vadd.f32 %v681_v30, %v648_v29  ;;  %v698_v48 = vadd.f32 %v682_v36, %v649_v35 }
  0xda   : > { %v455_v56 = vpop.f32.mrf.mxu0 }
  0xdb   : > { %v456_v58 = vadd.f32 %v2642_v53, %v455_v56 }
  0xdd   : > { %v509_v60 = vmax.f32 %v456_v58, 0.0  ;;  %502 = vmatmul.f32.gmra.mxu0 %v2575_v21  ;;  %1242 = vmatmul.f32.gmra.mxu2 %v2033_v57  ;;  %v371_v21 = vld [vmem:[#allocation9 + $0x8] sm:$0xff]  ;;  %v2681_v58 = vperm.slane %v368_v44, 0 }
  0xde   : > { %1076 = vmatpush.msra.mxu1 %v371_v21  ;;  %1800 = vmatpush.msra.mxu3 %v371_v21 }
  0xdf   : > { %v2647_v62 = vmin.f32 %v509_v60, 6.0 }
  0xe0   : > { %v1195_v1 = vpop.f32.mrf.mxu2  ;;  %1077 = vmatpush.msra.mxu1 %v370_v26  ;;  %1801 = vmatpush.msra.mxu3 %v370_v26 }
  0xe1   : > { %548 = vst [vmem:[#allocation2 + $0x19] sm:$0xff] %v2647_v62  ;;  %v1196_v2 = vadd.f32 %v2642_v53, %v1195_v1  ;;  %v634_v52 = vmul.f32 %v2654_v7, %v2647_v62  ;;  %v779_v57 = vmul.f32 %v2670_v42, %v2647_v62 }
  0xe2   : > { %v458_v4 = vpop.f32.mrf.mxu0 }
  0xe3   : > { %v1249_v8 = vmax.f32 %v1196_v2, 0.0  ;;  %v459_v9 = vadd.f32 %v2642_v53, %v458_v4 }
  0xe5   : > { %v1267_v14 = vmin.f32 %v1249_v8, 6.0  ;;  %v510_v15 = vmax.f32 %v459_v9, 0.0  ;;  %505 = vmatmul.f32.gmra.mxu0 %v2580_v23  ;;  %1245 = vmatmul.f32.gmra.mxu2 %v2034_v5 }
  0xe7   : > { %v528_v20 = vmin.f32 %v510_v15, 6.0  ;;  %1288 = vst [vmem:[#allocation2 + $0x1] sm:$0xff] %v1267_v14  ;;  %v1370_v1 = vmul.f32 %v1267_v14, %v2654_v7 }
  0xe8   : > { %v1198_v24 = vpop.f32.mrf.mxu2  ;;  %v713_v34 = vld [vmem:[#allocation2 + $0x18] sm:$0xff] }
  0xe9   : > { %549 = vst [vmem:[#allocation2 + $0x21] sm:$0xff] %v528_v20  ;;  %v1199_v23 = vadd.f32 %v2642_v53, %v1198_v24  ;;  %v730_v41 = vmul.f32 %v2665_v31, %v713_v34  ;;  %v585_v51 = vmul.f32 %v713_v34, %v2652_v6  ;;  %v780_v4 = vmul.f32 %v2670_v42, %v528_v20 }
  0xea   : > { %v461_v28 = vpop.f32.mrf.mxu0  ;;  %v635_v62 = vmul.f32 %v2654_v7, %v528_v20 }
  0xeb   : > { %v1250_v32 = vmax.f32 %v1199_v23, 0.0  ;;  %v462_v33 = vadd.f32 %v2642_v53, %v461_v28  ;;  %v746_v56 = vadd.f32 %v730_v41, %v697_v39  ;;  %v650_v10 = vadd.f32 %v634_v52, %v585_v51 }
  0xed   : > { %v1268_v37 = vmin.f32 %v1250_v32, 6.0  ;;  %v511_v38 = vmax.f32 %v462_v33, 0.0  ;;  %v795_v12 = vadd.f32 %v779_v57, %v746_v56 }
  0xee   : > { %v1306_v54 = vld [vmem:[#allocation2] sm:$0xff] }
  0xef   : > { %v529_v43 = vmin.f32 %v511_v38, 6.0  ;;  %1289 = vst [vmem:[#allocation2 + $0x9] sm:$0xff] %v1268_v37  ;;  %v1322_v5 = vmul.f32 %v1306_v54, %v2652_v6  ;;  %v1371_v14 = vmul.f32 %v1268_v37, %v2654_v7 }
  0xf0   : > { %v569_v45 = vld [vmem:[#allocation2 + $0x20] sm:$0xff]  ;;  %v1201_v46 = vpop.f32.mrf.mxu2 }
  0xf1   : > { %550 = vst [vmem:[#allocation2 + $0x31] sm:$0xff] %v529_v43  ;;  %v1202_v49 = vadd.f32 %v2642_v53, %v1201_v46  ;;  %v731_v50 = vmul.f32 %v2665_v31, %v569_v45  ;;  %v811_v63 = vld [vmem:[#allocation2 + $0x1a] sm:$0xff]  ;;  %v667_v2 = vld [vmem:[#allocation2 + $0x22] sm:$0xff]  ;;  %v586_v11 = vmul.f32 %v2652_v6, %v569_v45  ;;  %v927_v18 = vmul.f32 %v2683_v59, %v529_v43 }
  0xf2   : > { %v464_v55 = vpop.f32.mrf.mxu0  ;;  %v828_v13 = vmul.f32 %v2672_v47, %v811_v63  ;;  %v683_v15 = vmul.f32 %v811_v63, %v2660_v19  ;;  %v829_v21 = vmul.f32 %v2672_v47, %v667_v2  ;;  %v781_v20 = vmul.f32 %v2670_v42, %v529_v43 }
  0xf3   : > { %v1251_v60 = vmax.f32 %v1202_v49, 0.0  ;;  %v465_v61 = vadd.f32 %v2642_v53, %v464_v55  ;;  %v747_v3 = vadd.f32 %v731_v50, %v698_v48  ;;  %v1386_v26 = vadd.f32 %v1370_v1, %v1322_v5 }
  0xf4   : > { %v684_v27 = vmul.f32 %v2660_v19, %v667_v2  ;;  %v651_v33 = vadd.f32 %v635_v62, %v586_v11  ;;  %v844_v35 = vadd.f32 %v828_v13, %v795_v12  ;;  %v699_v36 = vadd.f32 %v683_v15, %v650_v10 }
  0xf5   : > { %v1269_v8 = vmin.f32 %v1251_v60, 6.0  ;;  %v512_v9 = vmax.f32 %v465_v61, 0.0  ;;  %v796_v23 = vadd.f32 %v780_v4, %v747_v3  ;;  %v636_v39 = vmul.f32 %v2654_v7, %v529_v43 }
  0xf6   : > { %v1307_v16 = vld [vmem:[#allocation2 + $0x8] sm:$0xff]  ;;  %v700_v55 = vadd.f32 %v684_v27, %v651_v33 }
  0xf7   : > { %v530_v17 = vmin.f32 %v512_v9, 6.0  ;;  %1290 = vst [vmem:[#allocation2 + $0x19] sm:$0xff] %v1269_v8  ;;  %v1402_v22 = vld [vmem:[#allocation2 + $0x2] sm:$0xff]  ;;  %v1323_v28 = vmul.f32 %v1307_v16, %v2652_v6  ;;  %v1403_v38 = vld [vmem:[#allocation2 + $0xa] sm:$0xff]  ;;  %v845_v49 = vadd.f32 %v829_v21, %v796_v23  ;;  %v1514_v51 = vmul.f32 %v1269_v8, %v2670_v42 }
  0xf8   : > { %v570_v24 = vld [vmem:[#allocation2 + $0x30] sm:$0xff]  ;;  %v1204_v25 = vpop.f32.mrf.mxu2  ;;  %v1418_v37 = vmul.f32 %v1402_v22, %v2660_v19  ;;  %v1419_v56 = vmul.f32 %v1403_v38, %v2660_v19  ;;  %v1372_v63 = vmul.f32 %v1269_v8, %v2654_v7 }
  0xf9   : > { %551 = vst [vmem:[#allocation2 + $0x39] sm:$0xff] %v530_v17  ;;  %v1205_v29 = vadd.f32 %v2642_v53, %v1204_v25  ;;  %v878_v30 = vmul.f32 %v2681_v58, %v570_v24  ;;  %v732_v32 = vmul.f32 %v2665_v31, %v570_v24  ;;  %v1387_v45 = vadd.f32 %v1371_v14, %v1323_v28  ;;  %v2732_v14 = vld [vmem:[%s3622_s4] ss:$0 sm:$0xff] }
  0xfa   : > { %v467_v34 = vpop.f32.mrf.mxu0  ;;  %v587_v46 = vmul.f32 %v2652_v6, %v570_v24  ;;  %v928_v57 = vmul.f32 %v2683_v59, %v530_v17  ;;  %v1434_v60 = vadd.f32 %v1418_v37, %v1386_v26  ;;  %v782_v61 = vmul.f32 %v2670_v42, %v530_v17 }
  0xfb   : > { %v1252_v41 = vmax.f32 %v1205_v29, 0.0  ;;  %v468_v44 = vadd.f32 %v2642_v53, %v467_v34  ;;  %v894_v48 = vadd.f32 %v878_v30, %v844_v35  ;;  %v748_v50 = vadd.f32 %v732_v32, %v699_v36 }
  0xfc   : > { %v1435_v3 = vadd.f32 %v1419_v56, %v1387_v45  ;;  %v2716_v4 = vadd.f32 %v636_v39, %v587_v46  ;;  %v2724_v8 = vmul.f32 %v2654_v7, %v530_v17 }
  0xfd   : > { %v1270_v52 = vmin.f32 %v1252_v41, 6.0  ;;  %v513_v54 = vmax.f32 %v468_v44, 0.0  ;;  %v943_v11 = vadd.f32 %v927_v18, %v894_v48  ;;  %v797_v12 = vadd.f32 %v781_v20, %v748_v50 }
  0xfe   : > { %v1450_v43 = vld [vmem:[#allocation2 + $0x18] sm:$0xff] }
  0xff   : > { %v2713_v1 = vmin.f32 %v513_v54, 6.0  ;;  %1291 = vst [vmem:[#allocation2 + $0x21] sm:$0xff] %v1270_v52  ;;  %v1466_v2 = vmul.f32 %v1450_v43, %v2665_v31  ;;  %v1515_v13 = vmul.f32 %v1270_v52, %v2670_v42  ;;  %v1324_v21 = vmul.f32 %v1450_v43, %v2652_v6 }
 0x100   : > { %v2718_v5 = vld [vmem:[#allocation2 + $0x38] sm:$0xff]  ;;  %v1207_v10 = vpop.f32.mrf.mxu2  ;;  %v2746_v33 = vmul.f32 %v1270_v52, %v2654_v7 }
 0x101   : > { %v668_v62 = vld [vmem:[#allocation2 + $0x32] sm:$0xff]  ;;  %v2720_v9 = vld [vmem:[#allocation2 + $0x3a] sm:$0xff]  ;;  %552 = vst [vmem:[#allocation2 + $0x49] sm:$0xff] %v2713_v1  ;;  %v1208_v15 = vadd.f32 %v2642_v53, %v1207_v10  ;;  %v879_v18 = vmul.f32 %v2681_v58, %v2718_v5  ;;  %v1482_v24 = vadd.f32 %v1466_v2, %v1434_v60  ;;  %v733_v25 = vmul.f32 %v2665_v31, %v2718_v5 }
 0x102   : > { %v976_v16 = vmul.f32 %v2686_v0, %v668_v62  ;;  %v470_v20 = vpop.f32.mrf.mxu0  ;;  %v977_v17 = vmul.f32 %v2686_v0, %v2720_v9  ;;  %v830_v22 = vmul.f32 %v2672_v47, %v668_v62  ;;  %v929_v30 = vmul.f32 %v2683_v59, %v2713_v1 }
 0x103   : > { %v1253_v23 = vmax.f32 %v1208_v15, 0.0  ;;  %v471_v26 = vadd.f32 %v2642_v53, %v470_v20  ;;  %v895_v28 = vadd.f32 %v879_v18, %v845_v49  ;;  %v749_v32 = vadd.f32 %v733_v25, %v700_v55 }
 0x104   : > { %v992_v27 = vadd.f32 %v976_v16, %v943_v11  ;;  %v846_v29 = vadd.f32 %v830_v22, %v797_v12  ;;  %v1530_v38 = vadd.f32 %v1514_v51, %v1482_v24  ;;  %v831_v44 = vmul.f32 %v2672_v47, %v2720_v9 }
 0x105   : > { %v2748_v34 = vmin.f32 %v1253_v23, 6.0  ;;  %v514_v35 = vmax.f32 %v471_v26, 0.0  ;;  %v944_v37 = vadd.f32 %v928_v57, %v895_v28  ;;  %v798_v41 = vadd.f32 %v782_v61, %v749_v32 }
 0x106   : > { %v1011_v36 = vadd.f32 %v2732_v14, %v992_v27  ;;  %v1546_v39 = vld [vmem:[#allocation2 + $0x1a] sm:$0xff]  ;;  %v685_v46 = vmul.f32 %v2660_v19, %v668_v62  ;;  %v2760_v54 = vld [vmem:[#allocation2 + $0x22] sm:$0xff]  ;;  %v783_v60 = vmul.f32 %v2670_v42, %v2713_v1  ;;  %v1388_v43 = vadd.f32 %v1372_v63, %v1324_v21 }
 0x107   : > { %v2753_v45 = vld [vmem:[#allocation2 + $0x20] sm:$0xff]  ;;  %v2756_v48 = vmin.f32 %v514_v35, 6.0  ;;  %v993_v50 = vadd.f32 %v977_v17, %v944_v37  ;;  %1292 = vst [vmem:[#allocation2 + $0x31] sm:$0xff] %v2748_v34  ;;  %v1562_v52 = vmul.f32 %v1546_v39, %v2672_v47  ;;  %v1658_v56 = vmul.f32 %v2748_v34, %v2683_v59 }
 0x108   : > { %v1027_v49 = vmax.f32 %v1011_v36, 0.0  ;;  %v2762_v51 = vld [vmem:[#allocation2 + $0x48] sm:$0xff]  ;;  %v1210_v55 = vpop.f32.mrf.mxu2  ;;  %v1467_v57 = vmul.f32 %v2753_v45, %v2665_v31  ;;  %v847_v15 = vadd.f32 %v831_v44, %v798_v41  ;;  %v1563_v18 = vmul.f32 %v2760_v54, %v2672_v47 }
 0x109   : > { %553 = vst [vmem:[#allocation2 + $0x51] sm:$0xff] %v2756_v48  ;;  %v1211_v61 = vadd.f32 %v2642_v53, %v1210_v55  ;;  %v1012_v62 = vadd.f32 %v2732_v14, %v993_v50  ;;  %v880_v10 = vmul.f32 %v2681_v58, %v2762_v51  ;;  %v1578_v12 = vadd.f32 %v1562_v52, %v1530_v38 }
 0x10a   : > { %v1043_v2 = vmin.f32 %v1027_v49, 6.0  ;;  %v473_v11 = vpop.f32.mrf.mxu0  ;;  %v1483_v16 = vadd.f32 %v1467_v57, %v1435_v3  ;;  %v701_v24 = vadd.f32 %v685_v46, %v2716_v4  ;;  %v734_v25 = vmul.f32 %v2665_v31, %v2762_v51 }
 0x10b   : > { %v1254_v20 = vmax.f32 %v1211_v61, 0.0  ;;  %v474_v63 = vadd.f32 %v2642_v53, %v473_v11  ;;  %v1028_v21 = vmax.f32 %v1012_v62, 0.0  ;;  %v896_v17 = vadd.f32 %v880_v10, %v846_v29 }
 0x10c   : > { %1078 = vmatmul.f32.vlgmr.msra.gmra.mxu1 %v1043_v2  ;;  %v1531_v22 = vadd.f32 %v1515_v13, %v1483_v16  ;;  %v1420_v23 = vmul.f32 %v1546_v39, %v2660_v19  ;;  %v930_v27 = vmul.f32 %v2683_v59, %v2756_v48  ;;  %v1516_v28 = vmul.f32 %v2748_v34, %v2670_v42 }
 0x10d   : > { %v2782_v26 = vmin.f32 %v1254_v20, 6.0  ;;  %v515_v3 = vmax.f32 %v474_v63, 0.0  ;;  %v1044_v32 = vmin.f32 %v1028_v21, 6.0  ;;  %v945_v35 = vadd.f32 %v929_v30, %v896_v17 }
 0x10e   : > { %v2788_v29 = vld [vmem:[#allocation2 + $0x30] sm:$0xff]  ;;  %v750_v13 = vadd.f32 %v734_v25, %v701_v24  ;;  %v588_v4 = vmul.f32 %v2652_v6, %v2718_v5  ;;  %v1579_v38 = vadd.f32 %v1563_v18, %v1531_v22  ;;  %v1436_v50 = vadd.f32 %v1420_v23, %v1388_v43 }
 0x10f   : > { %v2792_v36 = vmin.f32 %v515_v3, 6.0  ;;  %1293 = vst [vmem:[#allocation2 + $0x39] sm:$0xff] %v2782_v26  ;;  %v1610_v37 = vmul.f32 %v2788_v29, %v2681_v58  ;;  %v1468_v39 = vmul.f32 %v2788_v29, %v2665_v31  ;;  %v1659_v5 = vmul.f32 %v2782_v26, %v2683_v59 }
 0x110   : > { %v2799_v41 = vld [vmem:[#allocation2 + $0x50] sm:$0xff]  ;;  %v1213_v46 = vpop.f32.mrf.mxu2  ;;  %v799_v49 = vadd.f32 %v783_v60, %v750_v13  ;;  %v653_v52 = vadd.f32 %v2724_v8, %v588_v4  ;;  %v686_v60 = vmul.f32 %v2660_v19, %v2720_v9  ;;  %v784_v8 = vmul.f32 %v2670_v42, %v2756_v48 }
 0x111   : > { %v2801_v30 = vld [vmem:[#allocation2 + $0x4a] sm:$0xff]  ;;  %v2803_v44 = vld [vmem:[#allocation2 + $0x52] sm:$0xff]  ;;  %554 = vst [vmem:[#allocation2 + $0x61] sm:$0xff] %v2792_v36  ;;  %v1214_v55 = vadd.f32 %v2642_v53, %v1213_v46  ;;  %v1626_v61 = vadd.f32 %v1610_v37, %v1578_v12  ;;  %v881_v2 = vmul.f32 %v2681_v58, %v2799_v41  ;;  %v1484_v11 = vadd.f32 %v1468_v39, %v1436_v50 }
 0x112   : > { %v978_v57 = vmul.f32 %v2686_v0, %v2801_v30  ;;  %v476_v62 = vpop.f32.mrf.mxu0  ;;  %v832_v10 = vmul.f32 %v2672_v47, %v2801_v30  ;;  %v979_v12 = vmul.f32 %v2686_v0, %v2803_v44  ;;  %v931_v17 = vmul.f32 %v2683_v59, %v2792_v36 }
 0x113   : > { %v1255_v43 = vmax.f32 %v1214_v55, 0.0  ;;  %v477_v16 = vadd.f32 %v2642_v53, %v476_v62  ;;  %v1674_v20 = vadd.f32 %v1658_v56, %v1626_v61  ;;  %v897_v63 = vadd.f32 %v881_v2, %v847_v15 }
 0x114   : > { %1081 = vmatmul.f32.gmra.mxu1 %v1044_v32  ;;  %v994_v18 = vadd.f32 %v978_v57, %v945_v35  ;;  %v848_v21 = vadd.f32 %v832_v10, %v799_v49  ;;  %v1532_v25 = vadd.f32 %v1516_v28, %v1484_v11  ;;  %v702_v13 = vadd.f32 %v686_v60, %v653_v52 }
 0x115   : > { %v2825_v22 = vmin.f32 %v1255_v43, 6.0  ;;  %v516_v9 = vmax.f32 %v477_v16, 0.0  ;;  %v946_v3 = vadd.f32 %v930_v27, %v897_v63  ;;  %v735_v56 = vmul.f32 %v2665_v31, %v2799_v41 }
 0x116   : > { %v1013_v24 = vadd.f32 %v2732_v14, %v994_v18  ;;  %v2828_v23 = vld [vmem:[#allocation2 + $0x32] sm:$0xff]  ;;  %v2832_v35 = vld [vmem:[#allocation2 + $0x3a] sm:$0xff]  ;;  %v833_v15 = vmul.f32 %v2672_v47, %v2803_v44  ;;  %v1325_v52 = vmul.f32 %v2753_v45, %v2652_v6  ;;  %v1421_v55 = vmul.f32 %v2760_v54, %v2660_v19 }
 0x117   : > { %v2830_v32 = vld [vmem:[#allocation2 + $0x38] sm:$0xff]  ;;  %v2838_v4 = vmin.f32 %v516_v9, 6.0  ;;  %v1706_v28 = vmul.f32 %v2828_v23, %v2686_v0  ;;  %1294 = vst [vmem:[#allocation2 + $0x49] sm:$0xff] %v2825_v22  ;;  %v995_v49 = vadd.f32 %v979_v12, %v946_v3  ;;  %v1707_v50 = vmul.f32 %v2832_v35, %v2686_v0 }
 0x118   : > { %v1029_v37 = vmax.f32 %v1013_v24, 0.0  ;;  %v1611_v27 = vmul.f32 %v2830_v32, %v2681_v58  ;;  %v2845_v39 = vld [vmem:[#allocation2 + $0x60] sm:$0xff]  ;;  %v1216_v46 = vpop.f32.mrf.mxu2  ;;  %v1564_v43 = vmul.f32 %v2828_v23, %v2672_v47  ;;  %v751_v45 = vadd.f32 %v735_v56, %v702_v13 }
 0x119   : > { %555 = vst [vmem:[#allocation2 + $0x69] sm:$0xff] %v2838_v4  ;;  %v1217_v57 = vadd.f32 %v2642_v53, %v1216_v46  ;;  %v1722_v2 = vadd.f32 %v1706_v28, %v1674_v20  ;;  %v1014_v11 = vadd.f32 %v2732_v14, %v995_v49  ;;  %v882_v60 = vmul.f32 %v2681_v58, %v2845_v39 }
 0x11a   : > { %v1045_v61 = vmin.f32 %v1029_v37, 6.0  ;;  %v1627_v62 = vadd.f32 %v1611_v27, %v1579_v38  ;;  %v479_v10 = vpop.f32.mrf.mxu0  ;;  %v1660_v38 = vmul.f32 %v2825_v22, %v2683_v59  ;;  %v800_v9 = vadd.f32 %v784_v8, %v751_v45 }
 0x11b   : > { %v1256_v16 = vmax.f32 %v1217_v57, 0.0  ;;  %v480_v54 = vadd.f32 %v2642_v53, %v479_v10  ;;  %v1738_v18 = vadd.f32 %v2732_v14, %v1722_v2  ;;  %v1030_v63 = vmax.f32 %v1014_v11, 0.0 }
 0x11c   : > { %1084 = vmatmul.f32.gmra.mxu1 %v1045_v61  ;;  %v1675_v12 = vadd.f32 %v1659_v5, %v1627_v62  ;;  %v898_v20 = vadd.f32 %v882_v60, %v848_v21  ;;  %v1580_v13 = vadd.f32 %v1564_v43, %v1532_v25  ;;  %v932_v46 = vmul.f32 %v2683_v59, %v2838_v4 }
 0x11d   : > { %v2864_v24 = vmin.f32 %v1256_v16, 6.0  ;;  %v517_v3 = vmax.f32 %v480_v54, 0.0  ;;  %v1754_v37 = vmax.f32 %v1738_v18, 0.0  ;;  %v1046_v27 = vmin.f32 %v1030_v63, 6.0 }
 0x11e   : > { %v1723_v28 = vadd.f32 %v1707_v50, %v1675_v12  ;;  %v2866_v56 = vld [vmem:[#allocation2 + $0x48] sm:$0xff]  ;;  %v1389_v5 = vadd.f32 %v2746_v33, %v1325_v52  ;;  %v947_v62 = vadd.f32 %v931_v17, %v898_v20  ;;  %v849_v10 = vadd.f32 %v833_v15, %v800_v9 }
 0x11f   : > { %v2871_v49 = vmin.f32 %v517_v3, 6.0  ;;  %v1770_v21 = vmin.f32 %v1754_v37, 6.0  ;;  %1295 = vst [vmem:[#allocation2 + $0x51] sm:$0xff] %v2864_v24  ;;  %v1612_v8 = vmul.f32 %v2866_v56, %v2681_v58  ;;  %v1469_v52 = vmul.f32 %v2830_v32, %v2665_v31 }
 0x120   : > { %v1739_v57 = vadd.f32 %v2732_v14, %v1723_v28  ;;  %v2877_v50 = vld [vmem:[#allocation2 + $0x68] sm:$0xff]  ;;  %v1219_v2 = vpop.f32.mrf.mxu2  ;;  %v1437_v33 = vadd.f32 %v1421_v55, %v1389_v5  ;;  %v1517_v45 = vmul.f32 %v2782_v26, %v2670_v42  ;;  %v1565_v55 = vmul.f32 %v2832_v35, %v2672_v47 }
 0x121   : > { %v2879_v25 = vld [vmem:[#allocation2 + $0x62] sm:$0xff]  ;;  %v2881_v61 = vld [vmem:[#allocation2 + $0x6a] sm:$0xff]  ;;  %556 = vst [vmem:[#allocation2 + $0x79] sm:$0xff] %v2871_v49  ;;  %v1220_v11 = vadd.f32 %v2642_v53, %v1219_v2  ;;  %1802 = vmatmul.f32.vlgmr.msra.gmra.mxu3 %v1770_v21  ;;  %v1628_v54 = vadd.f32 %v1612_v8, %v1580_v13  ;;  %v883_v17 = vmul.f32 %v2681_v58, %v2877_v50 }
 0x122   : > { %v1755_v60 = vmax.f32 %v1739_v57, 0.0  ;;  %v980_v43 = vmul.f32 %v2686_v0, %v2879_v25  ;;  %v482_v16 = vpop.f32.mrf.mxu0  ;;  %v1485_v15 = vadd.f32 %v1469_v52, %v1437_v33  ;;  %v981_v20 = vmul.f32 %v2686_v0, %v2881_v61 }
 0x123   : > { %v1257_v18 = vmax.f32 %v1220_v11, 0.0  ;;  %v483_v12 = vadd.f32 %v2642_v53, %v482_v16  ;;  %v899_v3 = vadd.f32 %v883_v17, %v849_v10  ;;  %v589_v28 = vmul.f32 %v2652_v6, %v2762_v51 }
 0x124   : > { %1087 = vmatmul.f32.gmra.mxu1 %v1046_v27  ;;  %v996_v63 = vadd.f32 %v980_v43, %v947_v62  ;;  %v1771_v9 = vmin.f32 %v1755_v60, 6.0  ;;  %v1533_v37 = vadd.f32 %v1517_v45, %v1485_v15  ;;  %v638_v57 = vmul.f32 %v2654_v7, %v2713_v1 }
 0x125   : > { %v2900_v13 = vmin.f32 %v1257_v18, 6.0  ;;  %v518_v5 = vmax.f32 %v483_v12, 0.0  ;;  %v1676_v8 = vadd.f32 %v1660_v38, %v1628_v54  ;;  %v948_v2 = vadd.f32 %v932_v46, %v899_v3 }
 0x126   : > { %v1015_v21 = vadd.f32 %v2732_v14, %v996_v63  ;;  %v2905_v27 = vld [vmem:[#allocation2 + $0x4a] sm:$0xff]  ;;  %v1581_v62 = vadd.f32 %v1565_v55, %v1533_v37  ;;  %v687_v10 = vmul.f32 %v2660_v19, %v2801_v30  ;;  %v2917_v1 = vld [vmem:[#allocation2 + $0x52] sm:$0xff]  ;;  %v1661_v43 = vmul.f32 %v2864_v24, %v2683_v59 }
 0x127   : > { %v2907_v33 = vld [vmem:[#allocation2 + $0x50] sm:$0xff]  ;;  %v2911_v52 = vmin.f32 %v518_v5, 6.0  ;;  %v1708_v11 = vmul.f32 %v2905_v27, %v2686_v0  ;;  %1296 = vst [vmem:[#allocation2 + $0x61] sm:$0xff] %v2900_v13  ;;  %v997_v46 = vadd.f32 %v981_v20, %v948_v2  ;;  %v654_v45 = vadd.f32 %v638_v57, %v589_v28 }
 0x128   : > { %v1031_v51 = vmax.f32 %v1015_v21, 0.0  ;;  %v1613_v60 = vmul.f32 %v2907_v33, %v2681_v58  ;;  %v1222_v38 = vpop.f32.mrf.mxu2  ;;  %v736_v30 = vmul.f32 %v2665_v31, %v2845_v39  ;;  %v1709_v12 = vmul.f32 %v2917_v1, %v2686_v0  ;;  %v2931_v3 = vld [vmem:[#allocation2 + $0x78] sm:$0xff] }
 0x129   : > { %557 = vst [vmem:[#allocation2 + $0x81] sm:$0xff] %v2911_v52  ;;  %v1223_v16 = vadd.f32 %v2642_v53, %v1222_v38  ;;  %1805 = vmatmul.f32.gmra.mxu3 %v1771_v9  ;;  %v1724_v17 = vadd.f32 %v1708_v11, %v1676_v8  ;;  %v1016_v18 = vadd.f32 %v2732_v14, %v997_v46 }
 0x12a   : > { %v1047_v54 = vmin.f32 %v1031_v51, 6.0  ;;  %v1629_v15 = vadd.f32 %v1613_v60, %v1581_v62  ;;  %v485_v55 = vpop.f32.mrf.mxu0  ;;  %v703_v63 = vadd.f32 %v687_v10, %v654_v45  ;;  %v785_v20 = vmul.f32 %v2670_v42, %v2792_v36 }
 0x12b   : > { %v1258_v37 = vmax.f32 %v1223_v16, 0.0  ;;  %v486_v28 = vadd.f32 %v2642_v53, %v485_v55  ;;  %v1740_v9 = vadd.f32 %v2732_v14, %v1724_v17  ;;  %v1032_v21 = vmax.f32 %v1016_v18, 0.0 }
 0x12c   : > { %1090 = vmatmul.f32.gmra.mxu1 %v1047_v54  ;;  %v1677_v5 = vadd.f32 %v1661_v43, %v1629_v15  ;;  %v752_v57 = vadd.f32 %v736_v30, %v703_v63  ;;  %v834_v8 = vmul.f32 %v2672_v47, %v2879_v25  ;;  %v1326_v2 = vmul.f32 %v2788_v29, %v2652_v6 }
 0x12d   : > { %v2939_v62 = vmin.f32 %v1258_v37, 6.0  ;;  %v519_v10 = vmax.f32 %v486_v28, 0.0  ;;  %v1756_v51 = vmax.f32 %v1740_v9, 0.0  ;;  %v884_v38 = vmul.f32 %v2681_v58, %v2931_v3 }
 0x12e   : > { %v1725_v11 = vadd.f32 %v1709_v12, %v1677_v5  ;;  %v801_v60 = vadd.f32 %v785_v20, %v752_v57  ;;  %v1374_v46 = vmul.f32 %v2748_v34, %v2654_v7  ;;  %v1422_v43 = vmul.f32 %v2828_v23, %v2660_v19  ;;  %v2957_v23 = vld [vmem:[#allocation2 + $0x60] sm:$0xff] }
 0x12f   : > { %v2947_v45 = vmin.f32 %v519_v10, 6.0  ;;  %v1772_v30 = vmin.f32 %v1756_v51, 6.0  ;;  %v933_v16 = vmul.f32 %v2683_v59, %v2871_v49  ;;  %1297 = vst [vmem:[#allocation2 + $0x69] sm:$0xff] %v2939_v62  ;;  %v1048_v15 = vmin.f32 %v1032_v21, 6.0 }
 0x130   : > { %v1741_v29 = vadd.f32 %v2732_v14, %v1725_v11  ;;  %v2953_v54 = vld [vmem:[#allocation2 + $0x7a] sm:$0xff]  ;;  %v1225_v17 = vpop.f32.mrf.mxu2  ;;  %v850_v55 = vadd.f32 %v834_v8, %v801_v60  ;;  %v1390_v18 = vadd.f32 %v1374_v46, %v1326_v2  ;;  %v1470_v34 = vmul.f32 %v2866_v56, %v2665_v31 }
 0x131   : > { %558 = vst [vmem:[#allocation2 + $0x91] sm:$0xff] %v2947_v45  ;;  %v1226_v12 = vadd.f32 %v2642_v53, %v1225_v17  ;;  %1808 = vmatmul.f32.gmra.mxu3 %v1772_v30  ;;  %v1518_v20 = vmul.f32 %v2825_v22, %v2670_v42  ;;  %v1566_v37 = vmul.f32 %v2905_v27, %v2672_v47  ;;  %v2974_v11 = vld [vmem:[#allocation2 + $0x80] sm:$0xff] }
 0x132   : > { %v1757_v63 = vmax.f32 %v1741_v29, 0.0  ;;  %v488_v28 = vpop.f32.mrf.mxu0  ;;  %v900_v9 = vadd.f32 %v884_v38, %v850_v55  ;;  %v982_v5 = vmul.f32 %v2686_v0, %v2953_v54  ;;  %v1438_v21 = vadd.f32 %v1422_v43, %v1390_v18 }
 0x133   : > { %v590_v57 = vmul.f32 %v2652_v6, %v2799_v41  ;;  %v1259_v8 = vmax.f32 %v1226_v12, 0.0  ;;  %v489_v2 = vadd.f32 %v2642_v53, %v488_v28  ;;  %v1614_v10 = vmul.f32 %v2957_v23, %v2681_v58 }
 0x134   : > { %1093 = vmatmul.f32.gmra.mxu1 %v1048_v15  ;;  %v639_v51 = vmul.f32 %v2654_v7, %v2756_v48  ;;  %v949_v60 = vadd.f32 %v933_v16, %v900_v9  ;;  %v1486_v38 = vadd.f32 %v1470_v34, %v1438_v21  ;;  %v1662_v46 = vmul.f32 %v2900_v13, %v2683_v59 }
 0x135   : > { %v688_v41 = vmul.f32 %v2660_v19, %v2803_v44  ;;  %v2980_v43 = vmin.f32 %v1259_v8, 6.0  ;;  %v520_v30 = vmax.f32 %v489_v2, 0.0  ;;  %v737_v17 = vmul.f32 %v2665_v31, %v2877_v50 }
 0x136   : > { %v655_v29 = vadd.f32 %v639_v51, %v590_v57  ;;  %v1773_v15 = vmin.f32 %v1757_v63, 6.0  ;;  %v998_v55 = vadd.f32 %v982_v5, %v949_v60  ;;  %v1534_v48 = vadd.f32 %v1518_v20, %v1486_v38  ;;  %v2984_v18 = vld [vmem:[#allocation2 + $0x62] sm:$0xff] }
 0x137   : > { %v786_v16 = vmul.f32 %v2670_v42, %v2838_v4  ;;  %v2988_v34 = vmin.f32 %v520_v30, 6.0  ;;  %v835_v44 = vmul.f32 %v2672_v47, %v2881_v61  ;;  %v885_v28 = vmul.f32 %v2681_v58, %v2974_v11  ;;  %1298 = vst [vmem:[#allocation2 + $0x79] sm:$0xff] %v2980_v43  ;;  %v3000_v57 = vld [vmem:[#allocation2 + $0x82] sm:$0xff] }
 0x138   : > { %v704_v12 = vadd.f32 %v688_v41, %v655_v29  ;;  %v1228_v9 = vpop.f32.mrf.mxu2  ;;  %v1017_v63 = vadd.f32 %v2732_v14, %v998_v55  ;;  %v1582_v20 = vadd.f32 %v1566_v37, %v1534_v48  ;;  %v1710_v5 = vmul.f32 %v2984_v18, %v2686_v0 }
 0x139   : > { %v1327_v21 = vmul.f32 %v2830_v32, %v2652_v6  ;;  %559 = vst [vmem:[#allocation2 + $0x99] sm:$0xff] %v2988_v34  ;;  %v1229_v8 = vadd.f32 %v2642_v53, %v1228_v9  ;;  %1811 = vmatmul.f32.gmra.mxu3 %v1773_v15  ;;  %v1375_v51 = vmul.f32 %v2782_v26, %v2654_v7  ;;  %v3011_v9 = vld [vmem:[#allocation2 + $0x68] sm:$0xff] }
 0x13a   : > { %v753_v2 = vadd.f32 %v737_v17, %v704_v12  ;;  %v491_v60 = vpop.f32.mrf.mxu0  ;;  %v1033_v38 = vmax.f32 %v1017_v63, 0.0  ;;  %v1630_v37 = vadd.f32 %v1614_v10, %v1582_v20  ;;  %v1423_v41 = vmul.f32 %v2832_v35, %v2660_v19 }
 0x13b   : > { %v1471_v32 = vmul.f32 %v2907_v33, %v2665_v31  ;;  %v1260_v30 = vmax.f32 %v1229_v8, 0.0  ;;  %v492_v29 = vadd.f32 %v2642_v53, %v491_v60  ;;  %v1391_v48 = vadd.f32 %v1375_v51, %v1327_v21 }
 0x13c   : > { %v802_v55 = vadd.f32 %v786_v16, %v753_v2  ;;  %v1049_v17 = vmin.f32 %v1033_v38, 6.0  ;;  %v1678_v15 = vadd.f32 %v1662_v46, %v1630_v37  ;;  %v934_v26 = vmul.f32 %v2683_v59, %v2911_v52  ;;  %v3025_v2 = vld [vmem:[#allocation2 + $0x6a] sm:$0xff] }
 0x13d   : > { %v983_v10 = vmul.f32 %v2686_v0, %v3000_v57  ;;  %v3017_v12 = vmin.f32 %v1260_v30, 6.0  ;;  %v521_v35 = vmax.f32 %v492_v29, 0.0  ;;  %v1439_v20 = vadd.f32 %v1423_v41, %v1391_v48 }
 0x13e   : > { %v851_v63 = vadd.f32 %v835_v44, %v802_v55  ;;  %1096 = vmatmul.f32.gmra.mxu1 %v1049_v17  ;;  %v1726_v8 = vadd.f32 %v1710_v5, %v1678_v15  ;;  %v1519_v16 = vmul.f32 %v2864_v24, %v2670_v42  ;;  %v1567_v21 = vmul.f32 %v2917_v1, %v2672_v47  ;;  %v3039_v55 = vld [vmem:[#allocation2 + $0x90] sm:$0xff] }
 0x13f   : > { %v1615_v46 = vmul.f32 %v3011_v9, %v2681_v58  ;;  %v3027_v51 = vmin.f32 %v521_v35, 6.0  ;;  %v1487_v38 = vadd.f32 %v1471_v32, %v1439_v20  ;;  %v591_v44 = vmul.f32 %v2652_v6, %v2845_v39  ;;  %1299 = vst [vmem:[#allocation2 + $0x81] sm:$0xff] %v3017_v12 }
 0x140   : > { %v901_v60 = vadd.f32 %v885_v28, %v851_v63  ;;  %v1231_v5 = vpop.f32.mrf.mxu2  ;;  %v1742_v37 = vadd.f32 %v2732_v14, %v1726_v8  ;;  %v1663_v41 = vmul.f32 %v2939_v62, %v2683_v59  ;;  %v640_v30 = vmul.f32 %v2654_v7, %v2792_v36 }
 0x141   : > { %3648 = vst [vmem:[#allocation16_spill] sm:$0xff] %v3027_v51  ;;  %v689_v29 = vmul.f32 %v2660_v19, %v2879_v25  ;;  %v1232_v39 = vadd.f32 %v2642_v53, %v1231_v5  ;;  %v1535_v32 = vadd.f32 %v1519_v16, %v1487_v38  ;;  %v1711_v48 = vmul.f32 %v3025_v2, %v2686_v0  ;;  %v3054_v38 = vld [vmem:[#allocation2 + $0x92] sm:$0xff] }
 0x142   : > { %560 = vst [vmem:[#allocation2 + $0xa9] sm:$0xff] %v3027_v51  ;;  %v950_v28 = vadd.f32 %v934_v26, %v901_v60  ;;  %v1758_v17 = vmax.f32 %v1742_v37, 0.0  ;;  %v494_v15 = vpop.f32.mrf.mxu0  ;;  %v656_v35 = vadd.f32 %v640_v30, %v591_v44  ;;  %v738_v36 = vmul.f32 %v2665_v31, %v2931_v3  ;;  %v3059_v51 = vld [vmem:[#allocation2 + $0x98] sm:$0xff] }
 0x143   : > { %v787_v25 = vmul.f32 %v2670_v42, %v2871_v49  ;;  %v1261_v63 = vmax.f32 %v1232_v39, 0.0  ;;  %v495_v20 = vadd.f32 %v2642_v53, %v494_v15  ;;  %v1583_v40 = vadd.f32 %v1567_v21, %v1535_v32 }
 0x144   : > { %v999_v8 = vadd.f32 %v983_v10, %v950_v28  ;;  %v1774_v5 = vmin.f32 %v1758_v17, 6.0  ;;  %v705_v26 = vadd.f32 %v689_v29, %v656_v35  ;;  %v836_v16 = vmul.f32 %v2672_v47, %v2953_v54 }
 0x145   : > { %v886_v60 = vmul.f32 %v2681_v58, %v3039_v55  ;;  %v3056_v44 = vmin.f32 %v1261_v63, 6.0  ;;  %v522_v37 = vmax.f32 %v495_v20, 0.0  ;;  %v1631_v39 = vadd.f32 %v1615_v46, %v1583_v40  ;;  %v3071_v46 = vld [vmem:[#allocation2 + $0x78] sm:$0xff] }
 0x146   : > { %v1018_v30 = vadd.f32 %v2732_v14, %v999_v8  ;;  %1814 = vmatmul.f32.gmra.mxu3 %v1774_v5  ;;  %v754_v53 = vadd.f32 %v738_v36, %v705_v26  ;;  %v1328_v10 = vmul.f32 %v2866_v56, %v2652_v6  ;;  %v1376_v21 = vmul.f32 %v2825_v22, %v2654_v7 }
 0x147   : > { %v1424_v29 = vmul.f32 %v2905_v27, %v2660_v19  ;;  %v3067_v28 = vmin.f32 %v522_v37, 6.0  ;;  %v1679_v17 = vadd.f32 %v1663_v41, %v1631_v39  ;;  %v935_v40 = vmul.f32 %v2683_v59, %v2947_v45  ;;  %1300 = vst [vmem:[#allocation2 + $0x91] sm:$0xff] %v3056_v44  ;;  %v3082_v41 = vld [vmem:[%s3620_s2] ss:$0 sm:$0xff] }
 0x148   : > { %v1034_v32 = vmax.f32 %v1018_v30, 0.0  ;;  %v1234_v15 = vpop.f32.mrf.mxu2  ;;  %v803_v35 = vadd.f32 %v787_v25, %v754_v53  ;;  %v984_v56 = vmul.f32 %v2686_v0, %v3054_v38  ;;  %v1392_v22 = vadd.f32 %v1376_v21, %v1328_v10 }
 0x149   : > { %v1472_v27 = vmul.f32 %v2957_v23, %v2665_v31  ;;  %561 = vst [vmem:[#allocation2 + $0xb1] sm:$0xff] %v3067_v28  ;;  %v1235_v63 = vadd.f32 %v3082_v41, %v1234_v15  ;;  %v1727_v20 = vadd.f32 %v1711_v48, %v1679_v17  ;;  %v1520_v25 = vmul.f32 %v2900_v13, %v2670_v42  ;;  %v3095_v17 = vld [vmem:[#allocation2 + $0x7a] sm:$0xff] }
 0x14a   : > { %v1050_v36 = vmin.f32 %v1034_v32, 6.0  ;;  %v497_v8 = vpop.f32.mrf.mxu0  ;;  %v852_v5 = vadd.f32 %v836_v16, %v803_v35  ;;  %v1440_v26 = vadd.f32 %v1424_v29, %v1392_v22  ;;  %v1568_v37 = vmul.f32 %v2984_v18, %v2672_v47 }
 0x14b   : > { %v1616_v30 = vmul.f32 %v3071_v46, %v2681_v58  ;;  %v1262_v39 = vmax.f32 %v1235_v63, 0.0  ;;  %v1743_v53 = vadd.f32 %v2732_v14, %v1727_v20  ;;  %v498_v10 = vadd.f32 %v3082_v41, %v497_v8  ;;  %v3105_v63 = vld [vmem:[#allocation2 + $0x9a] sm:$0xff] }
 0x14c   : > { %1099 = vmatmul.f32.gmra.mxu1 %v1050_v36  ;;  %v592_v48 = vmul.f32 %v2652_v6, %v2877_v50  ;;  %v902_v21 = vadd.f32 %v886_v60, %v852_v5  ;;  %v1488_v32 = vadd.f32 %v1472_v27, %v1440_v26  ;;  %v641_v16 = vmul.f32 %v2654_v7, %v2838_v4 }
 0x14d   : > { %v690_v29 = vmul.f32 %v2660_v19, %v2881_v61  ;;  %v3101_v15 = vmin.f32 %v1262_v39, 6.0  ;;  %v1759_v35 = vmax.f32 %v1743_v53, 0.0  ;;  %v523_v22 = vmax.f32 %v498_v10, 0.0 }
 0x14e   : > { %v1664_v36 = vmul.f32 %v2980_v43, %v2683_v59  ;;  %v951_v50 = vadd.f32 %v935_v40, %v902_v21  ;;  %v1536_v60 = vadd.f32 %v1520_v25, %v1488_v32  ;;  %v657_v27 = vadd.f32 %v641_v16, %v592_v48 }
 0x14f   : > { %v739_v20 = vmul.f32 %v2665_v31, %v2974_v11  ;;  %v1775_v8 = vmin.f32 %v1759_v35, 6.0  ;;  %v3109_v4 = vmin.f32 %v523_v22, 6.0  ;;  %v1712_v61 = vmul.f32 %v3095_v17, %v2686_v0  ;;  %1301 = vst [vmem:[#allocation2 + $0x99] sm:$0xff] %v3101_v15 }
 0x150   : > { %v788_v5 = vmul.f32 %v2670_v42, %v2911_v52  ;;  %v1000_v26 = vadd.f32 %v984_v56, %v951_v50  ;;  %v1237_v39 = vpop.f32.mrf.mxu2  ;;  %v1584_v53 = vadd.f32 %v1568_v37, %v1536_v60  ;;  %v706_v40 = vadd.f32 %v690_v29, %v657_v27 }
 0x151   : > { %v837_v25 = vmul.f32 %v2672_v47, %v3000_v57  ;;  %1817 = vmatmul.f32.gmra.mxu3 %v1775_v8  ;;  %562 = vst [vmem:[#allocation2 + $0xc1] sm:$0xff] %v3109_v4  ;;  %v1238_v10 = vadd.f32 %v3082_v41, %v1237_v39  ;;  %v887_v48 = vmul.f32 %v2681_v58, %v3059_v51 }
 0x152   : > { %v1329_v21 = vmul.f32 %v2907_v33, %v2652_v6  ;;  %v1019_v32 = vadd.f32 %v2732_v14, %v1000_v26  ;;  %v1632_v56 = vadd.f32 %v1616_v30, %v1584_v53  ;;  %v500_v16 = vpop.f32.mrf.mxu0  ;;  %v755_v37 = vadd.f32 %v739_v20, %v706_v40  ;;  %v3138_v53 = vld [vmem:[#allocation2 + $0xa8] sm:$0xff]  ;;  %v3140_v40 = vld [vmem:[#allocation2 + $0xb0] sm:$0xff] }
 0x153   : > { %v1377_v29 = vmul.f32 %v2864_v24, %v2654_v7  ;;  %v1263_v35 = vmax.f32 %v1238_v10, 0.0  ;;  %v501_v22 = vadd.f32 %v3082_v41, %v500_v16  ;;  %v1425_v50 = vmul.f32 %v2917_v1, %v2660_v19  ;;  %v3136_v24 = vld [vmem:[#allocation2 + $0x80] sm:$0xff]  ;;  %v3142_v1 = vld [vmem:[#allocation2 + $0xaa] sm:$0xff] }
 0x154   : > { %v1473_v60 = vmul.f32 %v3011_v9, %v2665_v31  ;;  %v1035_v27 = vmax.f32 %v1019_v32, 0.0  ;;  %v1680_v8 = vadd.f32 %v1664_v36, %v1632_v56  ;;  %v804_v33 = vadd.f32 %v788_v5, %v755_v37 }
 0x155   : > { %v1393_v39 = vadd.f32 %v1377_v29, %v1329_v21  ;;  %v3132_v26 = vmin.f32 %v1263_v35, 6.0  ;;  %v524_v30 = vmax.f32 %v501_v22, 0.0  ;;  %v936_v20 = vmul.f32 %v2683_v59, %v2988_v34 }
 0x156   : > { %v1051_v10 = vmin.f32 %v1035_v27, 6.0  ;;  %v1728_v16 = vadd.f32 %v1712_v61, %v1680_v8  ;;  %v853_v32 = vadd.f32 %v837_v25, %v804_v33  ;;  %v985_v21 = vmul.f32 %v2686_v0, %v3105_v63  ;;  %v3160_v8 = vld [vmem:[#allocation2 + $0x82] sm:$0xff] }
 0x157   : > { %3649 = vst [vmem:[#allocation17_spill] sm:$0xff] %v3132_v26  ;;  %v1441_v36 = vadd.f32 %v1425_v50, %v1393_v39  ;;  %v3144_v5 = vmin.f32 %v524_v30, 6.0  ;;  %v1521_v56 = vmul.f32 %v2939_v62, %v2670_v42  ;;  %v1569_v37 = vmul.f32 %v3025_v2, %v2672_v47 }
 0x158   : > { %1302 = vst [vmem:[#allocation2 + $0xa9] sm:$0xff] %v3132_v26  ;;  %1102 = vmatmul.f32.gmra.mxu1 %v1051_v10  ;;  %v1744_v29 = vadd.f32 %v2732_v14, %v1728_v16  ;;  %v903_v35 = vadd.f32 %v887_v48, %v853_v32  ;;  %v1240_v61 = vpop.f32.mrf.mxu2  ;;  %v593_v22 = vmul.f32 %v2652_v6, %v2931_v3 }
 0x159   : > { %3650 = vst [vmem:[#allocation18_spill] sm:$0xff] %v3144_v5  ;;  %v1489_v25 = vadd.f32 %v1473_v60, %v1441_v36  ;;  %v1241_v50 = vadd.f32 %v3082_v41, %v1240_v61  ;;  %v1617_v27 = vmul.f32 %v3136_v24, %v2681_v58  ;;  %v642_v33 = vmul.f32 %v2654_v7, %v2871_v49 }
 0x15a   : > { %563 = vst [vmem:[#allocation2 + $0xc9] sm:$0xff] %v3144_v5  ;;  %v691_v48 = vmul.f32 %v2660_v19, %v2953_v54  ;;  %v1760_v39 = vmax.f32 %v1744_v29, 0.0  ;;  %v952_v60 = vadd.f32 %v936_v20, %v903_v35  ;;  %v1665_v3 = vmul.f32 %v3017_v12, %v2683_v59  ;;  %v503_v10 = vpop.f32.mrf.mxu0 }
 0x15b   : > { %v1537_v30 = vadd.f32 %v1521_v56, %v1489_v25  ;;  %v1264_v16 = vmax.f32 %v1241_v50, 0.0  ;;  %v504_v32 = vadd.f32 %v3082_v41, %v503_v10  ;;  %v658_v36 = vadd.f32 %v642_v33, %v593_v22  ;;  %v3177_v25 = vld [vmem:[#allocation2 + $0xb2] sm:$0xff] }
 0x15c   : > { %v740_v61 = vmul.f32 %v2665_v31, %v3039_v55  ;;  %v1776_v5 = vmin.f32 %v1760_v39, 6.0  ;;  %v1001_v26 = vadd.f32 %v985_v21, %v952_v60  ;;  %v1713_v54 = vmul.f32 %v3160_v8, %v2686_v0 }
 0x15d   : > { %v1585_v49 = vadd.f32 %v1569_v37, %v1537_v30  ;;  %v3173_v29 = vmin.f32 %v1264_v16, 6.0  ;;  %v525_v20 = vmax.f32 %v504_v32, 0.0  ;;  %v707_v56 = vadd.f32 %v691_v48, %v658_v36  ;;  %v3651_v30 = vld [vmem:[#allocation16_spill] sm:$0xff] }
 0x15e   : > { %v789_v35 = vmul.f32 %v2670_v42, %v2947_v45  ;;  %1820 = vmatmul.f32.gmra.mxu3 %v1776_v5  ;;  %v1020_v22 = vadd.f32 %v2732_v14, %v1001_v26  ;;  %v838_v21 = vmul.f32 %v2672_v47, %v3054_v38  ;;  %v1330_v37 = vmul.f32 %v2957_v23, %v2652_v6 }
 0x15f   : > { %v1633_v50 = vadd.f32 %v1617_v27, %v1585_v49  ;;  %v3184_v33 = vmin.f32 %v525_v20, 6.0  ;;  %v756_v39 = vadd.f32 %v740_v61, %v707_v56  ;;  %v1378_v48 = vmul.f32 %v2900_v13, %v2654_v7  ;;  %1303 = vst [vmem:[#allocation2 + $0xb1] sm:$0xff] %v3173_v29 }
 0x160   : > { %v1426_v60 = vmul.f32 %v2984_v18, %v2660_v19  ;;  %v1036_v5 = vmax.f32 %v1020_v22, 0.0  ;;  %v888_v27 = vmul.f32 %v2681_v58, %v3138_v53  ;;  %v937_v10 = vmul.f32 %v2683_v59, %v3651_v30  ;;  %v1243_v23 = vpop.f32.mrf.mxu2 }
 0x161   : > { %v1681_v26 = vadd.f32 %v1665_v3, %v1633_v50  ;;  %564 = vst [vmem:[#allocation2 + $0xd9] sm:$0xff] %v3184_v33  ;;  %v805_v16 = vadd.f32 %v789_v35, %v756_v39  ;;  %v1244_v32 = vadd.f32 %v3082_v41, %v1243_v23  ;;  %v1394_v13 = vadd.f32 %v1378_v48, %v1330_v37  ;;  %v3206_v39 = vld [vmem:[#allocation2 + $0x90] sm:$0xff] }
 0x162   : > { %v1474_v18 = vmul.f32 %v3071_v46, %v2665_v31  ;;  %v1052_v36 = vmin.f32 %v1036_v5, 6.0  ;;  %v986_v3 = vmul.f32 %v2686_v0, %v3142_v1  ;;  %v1522_v49 = vmul.f32 %v2980_v43, %v2670_v42  ;;  %v506_v20 = vpop.f32.mrf.mxu0  ;;  %v3215_v23 = vld [vmem:[#allocation2 + $0x92] sm:$0xff] }
 0x163   : > { %v1729_v61 = vadd.f32 %v1713_v54, %v1681_v26  ;;  %v854_v56 = vadd.f32 %v838_v21, %v805_v16  ;;  %v1265_v22 = vmax.f32 %v1244_v32, 0.0  ;;  %v1442_v50 = vadd.f32 %v1426_v60, %v1394_v13 }
 0x164   : > { %v1570_v35 = vmul.f32 %v3095_v17, %v2672_v47  ;;  %1105 = vmatmul.f32.gmra.mxu1 %v1052_v36  ;;  %v507_v54 = vadd.f32 %v3082_v41, %v506_v20  ;;  %v594_v48 = vmul.f32 %v2652_v6, %v2974_v11  ;;  %v643_v5 = vmul.f32 %v2654_v7, %v2911_v52  ;;  %v3225_v52 = vld [vmem:[#allocation2 + $0xc2] sm:$0xff] }
 0x165   : > { %v1745_v37 = vadd.f32 %v2732_v14, %v1729_v61  ;;  %v904_v26 = vadd.f32 %v888_v27, %v854_v56  ;;  %v3213_v21 = vmin.f32 %v1265_v22, 6.0  ;;  %v1490_v60 = vadd.f32 %v1474_v18, %v1442_v50  ;;  %v3219_v14 = vld [vmem:[#allocation2 + $0xc8] sm:$0xff]  ;;  %v3223_v61 = vld [vmem:[#allocation2 + $0xc0] sm:$0xff] }
 0x166   : > { %v692_v16 = vmul.f32 %v2660_v19, %v3000_v57  ;;  %v526_v13 = vmax.f32 %v507_v54, 0.0  ;;  %v659_v36 = vadd.f32 %v643_v5, %v594_v48  ;;  %v741_v11 = vmul.f32 %v2665_v31, %v3059_v51 }
 0x167   : > { %v1761_v32 = vmax.f32 %v1745_v37, 0.0  ;;  %v953_v27 = vadd.f32 %v937_v10, %v904_v26  ;;  %v1538_v20 = vadd.f32 %v1522_v49, %v1490_v60  ;;  %v1618_v18 = vmul.f32 %v3206_v39, %v2681_v58  ;;  %1304 = vst [vmem:[#allocation2 + $0xc1] sm:$0xff] %v3213_v21 }
 0x168   : > { %v1666_v57 = vmul.f32 %v3056_v44, %v2683_v59  ;;  %v3232_v22 = vmin.f32 %v526_v13, 6.0  ;;  %v708_v50 = vadd.f32 %v692_v16, %v659_v36  ;;  %v790_v37 = vmul.f32 %v2670_v42, %v2988_v34  ;;  %v1246_v54 = vpop.f32.mrf.mxu2 }
 0x169   : > { %v1777_v56 = vmin.f32 %v1761_v32, 6.0  ;;  %v1002_v48 = vadd.f32 %v986_v3, %v953_v27  ;;  %v1586_v5 = vadd.f32 %v1570_v35, %v1538_v20  ;;  %v1714_v10 = vmul.f32 %v3215_v23, %v2686_v0  ;;  %v3247_v3 = vld [vmem:[%s3622_s4] ss:$0 sm:$0xff] }
 0x16a   : > { %v839_v49 = vmul.f32 %v2672_v47, %v3105_v63  ;;  %565 = vst [vmem:[#allocation2 + $0xe1] sm:$0xff] %v3232_v22  ;;  %v757_v26 = vadd.f32 %v741_v11, %v708_v50  ;;  %v1247_v60 = vadd.f32 %v3082_v41, %v1246_v54  ;;  %v1331_v16 = vmul.f32 %v3011_v9, %v2652_v6 }
 0x16b   : > { %1823 = vmatmul.f32.gmra.mxu3 %v1777_v56  ;;  %v1021_v35 = vadd.f32 %v3247_v3, %v1002_v48  ;;  %v1634_v32 = vadd.f32 %v1618_v18, %v1586_v5  ;;  %v889_v13 = vmul.f32 %v2681_v58, %v3140_v40  ;;  %v1379_v36 = vmul.f32 %v2939_v62, %v2654_v7 }
 0x16c   : > { %v806_v11 = vadd.f32 %v790_v37, %v757_v26  ;;  %v938_v41 = vmul.f32 %v2683_v59, %v3067_v28  ;;  %v1266_v27 = vmax.f32 %v1247_v60, 0.0  ;;  %v1427_v9 = vmul.f32 %v3025_v2, %v2660_v19  ;;  %v3266_v37 = vld [vmem:[#allocation2 + $0x98] sm:$0xff]  ;;  %v3268_v26 = vld [vmem:[#allocation2 + $0xca] sm:$0xff] }
 0x16d   : > { %v1037_v20 = vmax.f32 %v1021_v35, 0.0  ;;  %v1682_v56 = vadd.f32 %v1666_v57, %v1634_v32  ;;  %v1395_v50 = vadd.f32 %v1379_v36, %v1331_v16  ;;  %v1475_v18 = vmul.f32 %v3136_v24, %v2665_v31  ;;  %v3272_v35 = vld [vmem:[#allocation2 + $0x9a] sm:$0xff] }
 0x16e   : > { %v855_v54 = vadd.f32 %v839_v49, %v806_v11  ;;  %v987_v48 = vmul.f32 %v2686_v0, %v3177_v25  ;;  %v3262_v5 = vmin.f32 %v1266_v27, 6.0  ;;  %v1523_v62 = vmul.f32 %v3017_v12, %v2670_v42 }
 0x16f   : > { %v1053_v2 = vmin.f32 %v1037_v20, 6.0  ;;  %v1730_v60 = vadd.f32 %v1714_v10, %v1682_v56  ;;  %v1443_v57 = vadd.f32 %v1427_v9, %v1395_v50  ;;  %v1571_v16 = vmul.f32 %v3160_v8, %v2672_v47 }
 0x170   : > { %3652 = vst [vmem:[#allocation16_spill] sm:$0xff] %v3262_v5  ;;  %v905_v49 = vadd.f32 %v889_v13, %v855_v54  ;;  %v595_v32 = vmul.f32 %v2652_v6, %v3039_v55  ;;  %v644_v36 = vmul.f32 %v2654_v7, %v2947_v45  ;;  %v693_v11 = vmul.f32 %v2660_v19, %v3054_v38 }
 0x171   : > { %1305 = vst [vmem:[#allocation2 + $0xc9] sm:$0xff] %v3262_v5  ;;  %1108 = vmatmul.f32.gmra.mxu1 %v1053_v2  ;;  %v1746_v10 = vadd.f32 %v3247_v3, %v1730_v60  ;;  %v1491_v27 = vadd.f32 %v1475_v18, %v1443_v57  ;;  %v1619_v9 = vmul.f32 %v3266_v37, %v2681_v58 }
 0x172   : > { %v1667_v13 = vmul.f32 %v3101_v15, %v2683_v59  ;;  %v954_v20 = vadd.f32 %v938_v41, %v905_v49  ;;  %v1715_v55 = vmul.f32 %v3272_v35, %v2686_v0  ;;  %v660_v45 = vadd.f32 %v644_v36, %v595_v32 }
 0x173   : > { %v742_v38 = vmul.f32 %v2665_v31, %v3138_v53  ;;  %v1762_v56 = vmax.f32 %v1746_v10, 0.0  ;;  %v1539_v50 = vadd.f32 %v1523_v62, %v1491_v27  ;;  %v791_v54 = vmul.f32 %v2670_v42, %v3651_v30 }
 0x174   : > { %v840_v18 = vmul.f32 %v2672_v47, %v3142_v1  ;;  %v1003_v2 = vadd.f32 %v987_v48, %v954_v20  ;;  %v709_v60 = vadd.f32 %v693_v11, %v660_v45  ;;  %v1332_v41 = vmul.f32 %v3071_v46, %v2652_v6  ;;  %v3311_v20 = vld [vmem:[#allocation2 + $0xa8] sm:$0xff] }
 0x175   : > { %v1380_v57 = vmul.f32 %v2980_v43, %v2654_v7  ;;  %v1778_v49 = vmin.f32 %v1762_v56, 6.0  ;;  %v1587_v32 = vadd.f32 %v1571_v16, %v1539_v50  ;;  %v890_v36 = vmul.f32 %v2681_v58, %v3223_v61 }
 0x176   : > { %v1428_v62 = vmul.f32 %v3095_v17, %v2660_v19  ;;  %v1022_v10 = vadd.f32 %v3247_v3, %v1003_v2  ;;  %v758_v27 = vadd.f32 %v742_v38, %v709_v60  ;;  %v1476_v48 = vmul.f32 %v3206_v39, %v2665_v31  ;;  %v3315_v2 = vld [vmem:[#allocation2 + $0xaa] sm:$0xff] }
 0x177   : > { %v1396_v5 = vadd.f32 %v1380_v57, %v1332_v41  ;;  %1826 = vmatmul.f32.gmra.mxu3 %v1778_v49  ;;  %v1635_v46 = vadd.f32 %v1619_v9, %v1587_v32  ;;  %v939_v43 = vmul.f32 %v2683_v59, %v3109_v4  ;;  %v988_v16 = vmul.f32 %v2686_v0, %v3225_v52 }
 0x178   : > { %v1524_v11 = vmul.f32 %v3056_v44, %v2670_v42  ;;  %v1038_v17 = vmax.f32 %v1022_v10, 0.0  ;;  %v807_v45 = vadd.f32 %v791_v54, %v758_v27  ;;  %v1572_v56 = vmul.f32 %v3215_v23, %v2672_v47 }
 0x179   : > { %v1444_v38 = vadd.f32 %v1428_v62, %v1396_v5  ;;  %v1683_v50 = vadd.f32 %v1667_v13, %v1635_v46  ;;  %v596_v9 = vmul.f32 %v2652_v6, %v3059_v51  ;;  %v645_v60 = vmul.f32 %v2654_v7, %v2988_v34  ;;  %v3653_v13 = vld [vmem:[#allocation17_spill] sm:$0xff] }
 0x17a   : > { %v694_v41 = vmul.f32 %v2660_v19, %v3105_v63  ;;  %v1054_v57 = vmin.f32 %v1038_v17, 6.0  ;;  %v856_v49 = vadd.f32 %v840_v18, %v807_v45  ;;  %v1620_v5 = vmul.f32 %v3311_v20, %v2681_v58 }
 0x17b   : > { %v1492_v32 = vadd.f32 %v1476_v48, %v1444_v38  ;;  %v1731_v54 = vadd.f32 %v1715_v55, %v1683_v50  ;;  %v1668_v62 = vmul.f32 %v3653_v13, %v2683_v59  ;;  %v661_v10 = vadd.f32 %v645_v60, %v596_v9  ;;  %v973_v50 = vld [vmem:[#allocation2 + $0xda] sm:$0xff] }
 0x17c   : > { %v743_v51 = vmul.f32 %v2665_v31, %v3140_v40  ;;  %1111 = vmatmul.f32.gmra.mxu1 %v1054_v57  ;;  %v906_v27 = vadd.f32 %v890_v36, %v856_v49  ;;  %v1716_v63 = vmul.f32 %v3315_v2, %v2686_v0  ;;  %v792_v18 = vmul.f32 %v2670_v42, %v3067_v28  ;;  %v3654_v57 = vld [vmem:[#allocation18_spill] sm:$0xff] }
 0x17d   : > { %v1540_v34 = vadd.f32 %v1524_v11, %v1492_v32  ;;  %v1747_v48 = vadd.f32 %v3247_v3, %v1731_v54  ;;  %v710_v46 = vadd.f32 %v694_v41, %v661_v10  ;;  %v841_v55 = vmul.f32 %v2672_v47, %v3177_v25  ;;  %v3348_v10 = vld [vmem:[#allocation2 + $0xe0] sm:$0xff] }
 0x17e   : > { %v1333_v17 = vmul.f32 %v3136_v24, %v2652_v6  ;;  %v955_v45 = vadd.f32 %v939_v43, %v906_v27  ;;  %v891_v36 = vmul.f32 %v2681_v58, %v3219_v14  ;;  %v1381_v11 = vmul.f32 %v3017_v12, %v2654_v7  ;;  %v3350_v27 = vld [vmem:[#allocation2 + $0xe2] sm:$0xff] }
 0x17f   : > { %v1588_v38 = vadd.f32 %v1572_v56, %v1540_v34  ;;  %v1763_v9 = vmax.f32 %v1747_v48, 0.0  ;;  %v759_v60 = vadd.f32 %v743_v51, %v710_v46  ;;  %v940_v41 = vmul.f32 %v2683_v59, %v3654_v57  ;;  %v875_v56 = vld [vmem:[#allocation2 + $0xd8] sm:$0xff] }
 0x180   : > { %v1429_v49 = vmul.f32 %v3160_v8, %v2660_v19  ;;  %v1004_v32 = vadd.f32 %v988_v16, %v955_v45  ;;  %v1397_v24 = vadd.f32 %v1381_v11, %v1333_v17  ;;  %v1477_v43 = vmul.f32 %v3266_v37, %v2665_v31  ;;  %v3356_v8 = vld [vmem:[#allocation2 + $0xb0] sm:$0xff] }
 0x181   : > { %v1636_v54 = vadd.f32 %v1620_v5, %v1588_v38  ;;  %v1779_v12 = vmin.f32 %v1763_v9, 6.0  ;;  %v808_v34 = vadd.f32 %v792_v18, %v759_v60  ;;  %v989_v51 = vmul.f32 %v2686_v0, %v3268_v26  ;;  %v3363_v38 = vld [vmem:[#allocation2 + $0xb2] sm:$0xff] }
 0x182   : > { %v1525_v48 = vmul.f32 %v3101_v15, %v2670_v42  ;;  %v3655_v16 = vmov 0.0   ;;  %v1023_v5 = vadd.f32 %v3247_v3, %v1004_v32  ;;  %v1445_v17 = vadd.f32 %v1429_v49, %v1397_v24 }
 0x183   : > { %1286 = vst [vmem:[#allocation2 + $0xd9] sm:$0xff] %v3655_v16  ;;  %v1684_v46 = vadd.f32 %v1668_v62, %v1636_v54  ;;  %v1573_v45 = vmul.f32 %v3272_v35, %v2672_v47  ;;  %1829 = vmatmul.f32.gmra.mxu3 %v1779_v12  ;;  %v857_v18 = vadd.f32 %v841_v55, %v808_v34 }
 0x184   : > { %1287 = vst [vmem:[#allocation2 + $0xe1] sm:$0xff] %v3655_v16  ;;  %v597_v11 = vmul.f32 %v2652_v6, %v3138_v53  ;;  %v646_v9 = vmul.f32 %v2654_v7, %v3651_v30  ;;  %v695_v60 = vmul.f32 %v2660_v19, %v3142_v1  ;;  %v1039_v62 = vmax.f32 %v1023_v5, 0.0 }
 0x185   : > { %v1732_v49 = vadd.f32 %v1716_v63, %v1684_v46  ;;  %v1493_v32 = vadd.f32 %v1477_v43, %v1445_v17  ;;  %v1621_v54 = vmul.f32 %v3356_v8, %v2681_v58  ;;  %v907_v24 = vadd.f32 %v891_v36, %v857_v18 }
 0x186   : > { %v1669_v55 = vmul.f32 %v3173_v29, %v2683_v59  ;;  %v662_v12 = vadd.f32 %v646_v9, %v597_v11  ;;  %v744_v53 = vmul.f32 %v3223_v61, %v2665_v31  ;;  %v1055_v34 = vmin.f32 %v1039_v62, 6.0 }
 0x187   : > { %v1748_v30 = vadd.f32 %v3247_v3, %v1732_v49  ;;  %v1541_v16 = vadd.f32 %v1525_v48, %v1493_v32  ;;  %v1717_v1 = vmul.f32 %v3363_v38, %v2686_v0  ;;  %v956_v63 = vadd.f32 %v940_v41, %v907_v24  ;;  %v3397_v32 = vld [vmem:[#allocation2 + $0xc0] sm:$0xff] }
 0x188   : > { %v711_v43 = vadd.f32 %v695_v60, %v662_v12  ;;  %v793_v5 = vmul.f32 %v2670_v42, %v3109_v4  ;;  %v842_v36 = vmul.f32 %v3225_v52, %v2672_v47  ;;  %1114 = vmatmul.f32.gmra.mxu1 %v1055_v34  ;;  %v1334_v61 = vmul.f32 %v3206_v39, %v2652_v6  ;;  %v3403_v34 = vld [vmem:[#allocation2 + $0xc2] sm:$0xff] }
 0x189   : > { %v1764_v46 = vmax.f32 %v1748_v30, 0.0  ;;  %v1589_v17 = vadd.f32 %v1573_v45, %v1541_v16  ;;  %v1382_v48 = vmul.f32 %v3056_v44, %v2654_v7  ;;  %v1079_v18 = vpop.f32.mrf.mxu1  ;;  %v1005_v11 = vadd.f32 %v989_v51, %v956_v63 }
 0x18a   : > { %v760_v9 = vadd.f32 %v744_v53, %v711_v43  ;;  %v892_v41 = vmul.f32 %v2681_v58, %v875_v56  ;;  %v1430_v4 = vmul.f32 %v3215_v23, %v2660_v19  ;;  %v1478_v45 = vmul.f32 %v3311_v20, %v2665_v31  ;;  %v3416_v43 = vld [vmem:[%s3624_s6] ss:$0 sm:$0xff] }
 0x18b   : > { %v1780_v60 = vmin.f32 %v1764_v46, 6.0  ;;  %v1637_v62 = vadd.f32 %v1621_v54, %v1589_v17  ;;  %v1398_v52 = vadd.f32 %v1382_v48, %v1334_v61  ;;  %v1024_v49 = vadd.f32 %v3247_v3, %v1005_v11 }
 0x18c   : > { %v809_v39 = vadd.f32 %v793_v5, %v760_v9  ;;  %v941_v44 = vmul.f32 %v2683_v59, %v3184_v33  ;;  %v990_v51 = vmul.f32 %v2686_v0, %v973_v50  ;;  %v1526_v23 = vmul.f32 %v3653_v13, %v2670_v42 }
 0x18d   : > { %1832 = vmatmul.f32.gmra.mxu3 %v1780_v60  ;;  %v1685_v56 = vadd.f32 %v1669_v55, %v1637_v62  ;;  %v1446_v24 = vadd.f32 %v1430_v4, %v1398_v52  ;;  %v1574_v54 = vmul.f32 %v3315_v2, %v2672_v47  ;;  %v1040_v12 = vmax.f32 %v1024_v49, 0.0 }
 0x18e   : > { %v858_v53 = vadd.f32 %v842_v36, %v809_v39  ;;  %v598_v33 = vmul.f32 %v2652_v6, %v3140_v40  ;;  %v647_v50 = vmul.f32 %v2654_v7, %v3067_v28  ;;  %v1622_v55 = vmul.f32 %v3397_v32, %v2681_v58 }
 0x18f   : > { %v1733_v30 = vadd.f32 %v1717_v1, %v1685_v56  ;;  %v1494_v16 = vadd.f32 %v1478_v45, %v1446_v24  ;;  %v696_v63 = vmul.f32 %v2660_v19, %v3177_v25  ;;  %v1056_v5 = vmin.f32 %v1040_v12, 6.0  ;;  %v2147_v56 = vld [vmem:[%s2549_s9] sm:$0xff] }
 0x190   : > { %v908_v36 = vadd.f32 %v892_v41, %v858_v53  ;;  %v663_v46 = vadd.f32 %v647_v50, %v598_v33  ;;  %v745_v40 = vmul.f32 %v2665_v31, %v3219_v14  ;;  %v1670_v17 = vmul.f32 %v3213_v21, %v2683_v59  ;;  %v1607_v50 = vld [vmem:[#allocation2 + $0xc8] sm:$0xff] }
 0x191   : > { %v1749_v28 = vadd.f32 %v3247_v3, %v1733_v30  ;;  %v1542_v1 = vadd.f32 %v1526_v23, %v1494_v16  ;;  %v1718_v25 = vmul.f32 %v3403_v34, %v2686_v0  ;;  %v1082_v61 = vpop.f32.mrf.mxu1  ;;  %1117 = vmatmul.f32.gmra.mxu1 %v1056_v5  ;;  %v794_v9 = vmul.f32 %v2670_v42, %v3654_v57 }
 0x192   : > { %v957_v48 = vadd.f32 %v941_v44, %v908_v36  ;;  %v712_v11 = vadd.f32 %v696_v63, %v663_v46  ;;  %v843_v14 = vmul.f32 %v2672_v47, %v3268_v26  ;;  %v1080_v60 = vadd.f32 %v3416_v43, %v1079_v18  ;;  %v1703_v46 = vld [vmem:[#allocation2 + $0xca] sm:$0xff] }
 0x193   : > { %v1765_v41 = vmax.f32 %v1749_v28, 0.0  ;;  %v1590_v4 = vadd.f32 %v1574_v54, %v1542_v1  ;;  %v1335_v62 = vmul.f32 %v3266_v37, %v2652_v6  ;;  %v893_v49 = vmul.f32 %v2681_v58, %v3348_v10 }
 0x194   : > { %v1006_v52 = vadd.f32 %v990_v51, %v957_v48  ;;  %v761_v45 = vadd.f32 %v745_v40, %v712_v11  ;;  %v1383_v39 = vmul.f32 %v3101_v15, %v2654_v7  ;;  %v1127_v26 = vadd.f32 %v2147_v56, %v1080_v60 }
 0x195   : > { %v1781_v57 = vmin.f32 %v1765_v41, 6.0  ;;  %v1638_v44 = vadd.f32 %v1622_v55, %v1590_v4  ;;  %v1431_v24 = vmul.f32 %v3272_v35, %v2660_v19  ;;  %v1479_v51 = vmul.f32 %v3356_v8, %v2665_v31  ;;  %v3656_v41 = vld [vmem:[#allocation16_spill] sm:$0xff] }
 0x196   : > { %v1025_v18 = vadd.f32 %v3247_v3, %v1006_v52  ;;  %v810_v23 = vadd.f32 %v794_v9, %v761_v45  ;;  %v1399_v37 = vadd.f32 %v1383_v39, %v1335_v62  ;;  %v942_v10 = vmul.f32 %v2683_v59, %v3232_v22  ;;  %1143 = vst [vmem:[%s3448_s14] sm:$0xff] %v1127_v26 }
 0x197   : > { %1835 = vmatmul.f32.gmra.mxu3 %v1781_v57  ;;  %v1686_v54 = vadd.f32 %v1670_v17, %v1638_v44  ;;  %v991_v15 = vmul.f32 %v2686_v0, %v3350_v27  ;;  %v1527_v33 = vmul.f32 %v3173_v29, %v2670_v42  ;;  %v1575_v22 = vmul.f32 %v3363_v38, %v2672_v47  ;;  %v2148_v17 = vld [vmem:[%s2549_s9 + $0x8] sm:$0xff] }
 0x198   : > { %v1041_v35 = vmax.f32 %v1025_v18, 0.0  ;;  %v859_v12 = vadd.f32 %v843_v14, %v810_v23  ;;  %v1447_v53 = vadd.f32 %v1431_v24, %v1399_v37  ;;  %v1083_v16 = vadd.f32 %v3416_v43, %v1082_v61 }
 0x199   : > { %v1734_v30 = vadd.f32 %v1718_v25, %v1686_v54  ;;  %v1336_v27 = vmul.f32 %v3311_v20, %v2652_v6  ;;  %v1085_v55 = vpop.f32.mrf.mxu1  ;;  %v1384_v40 = vmul.f32 %v3653_v13, %v2654_v7  ;;  %v1623_v1 = vmul.f32 %v1607_v50, %v2681_v58 }
 0x19a   : > { %v1057_v63 = vmin.f32 %v1041_v35, 6.0  ;;  %v909_v5 = vadd.f32 %v893_v49, %v859_v12  ;;  %v1495_v36 = vadd.f32 %v1479_v51, %v1447_v53  ;;  %v1128_v25 = vadd.f32 %v2148_v17, %v1083_v16  ;;  %v1608_v49 = vld [vmem:[#allocation2 + $0xd8] sm:$0xff] }
 0x19b   : > { %v1750_v28 = vadd.f32 %v3247_v3, %v1734_v30  ;;  %v1432_v61 = vmul.f32 %v3315_v2, %v2660_v19  ;;  %v1400_v11 = vadd.f32 %v1384_v40, %v1336_v27  ;;  %v1480_v9 = vmul.f32 %v3397_v32, %v2665_v31 }
 0x19c   : > { %1120 = vmatmul.f32.gmra.mxu1 %v1057_v63  ;;  %v958_v20 = vadd.f32 %v942_v10, %v909_v5  ;;  %v1543_v48 = vadd.f32 %v1527_v33, %v1495_v36  ;;  %v1671_v13 = vmul.f32 %v3656_v41, %v2683_v59  ;;  %v1719_v4 = vmul.f32 %v1703_v46, %v2686_v0  ;;  %v1704_v10 = vld [vmem:[#allocation2 + $0xda] sm:$0xff] }
 0x19d   : > { %v1766_v14 = vmax.f32 %v1750_v28, 0.0  ;;  %1144 = vst [vmem:[%s3448_s14 + $0x8] sm:$0xff] %v1128_v25  ;;  %v1448_v52 = vadd.f32 %v1432_v61, %v1400_v11  ;;  %v1528_v2 = vmul.f32 %v3213_v21, %v2670_v42  ;;  %v1086_v39 = vadd.f32 %v3416_v43, %v1085_v55  ;;  %v2149_v21 = vld [vmem:[%s2549_s9 + $0x10] sm:$0xff] }
 0x19e   : > { %v1007_v60 = vadd.f32 %v991_v15, %v958_v20  ;;  %v1591_v62 = vadd.f32 %v1575_v22, %v1543_v48  ;;  %v1337_v32 = vmul.f32 %v3356_v8, %v2652_v6  ;;  %v1385_v57 = vmul.f32 %v3173_v29, %v2654_v7  ;;  %v1705_v28 = vld [vmem:[#allocation2 + $0xe2] sm:$0xff] }
 0x19f   : > { %v1782_v45 = vmin.f32 %v1766_v14, 6.0  ;;  %v1496_v26 = vadd.f32 %v1480_v9, %v1448_v52  ;;  %v1576_v24 = vmul.f32 %v3403_v34, %v2672_v47  ;;  %v1129_v18 = vadd.f32 %v2149_v21, %v1086_v39  ;;  %v2153_v52 = vld [vmem:[%s2549_s9 + $0x88] sm:$0xff] }
 0x1a0   : > { %v1026_v44 = vadd.f32 %v3247_v3, %v1007_v60  ;;  %v1639_v56 = vadd.f32 %v1623_v1, %v1591_v62  ;;  %v1401_v23 = vadd.f32 %v1385_v57, %v1337_v32  ;;  %v1433_v37 = vmul.f32 %v3363_v38, %v2660_v19  ;;  %v1609_v38 = vld [vmem:[#allocation2 + $0xe0] sm:$0xff]  ;;  %v2151_v1 = vld [vmem:[%s2549_s9 + $0x80] sm:$0xff]  ;;  %v2154_v32 = vld [vmem:[%s2549_s9 + $0x28] sm:$0xff] }
 0x1a1   : > { %1838 = vmatmul.f32.gmra.mxu3 %v1782_v45  ;;  %v1481_v6 = vmul.f32 %v1607_v50, %v2665_v31  ;;  %v1088_v8 = vpop.f32.mrf.mxu1  ;;  %v1544_v51 = vadd.f32 %v1528_v2, %v1496_v26  ;;  %v1624_v54 = vmul.f32 %v1608_v49, %v2681_v58  ;;  %1145 = vst [vmem:[%s3448_s14 + $0x10] sm:$0xff] %v1129_v18  ;;  %v1672_v19 = vmul.f32 0.0, %v2683_v59  ;;  %v2150_v50 = vld [vmem:[%s2549_s9 + $0x18] sm:$0xff] }
 0x1a2   : > { %v1042_v7 = vmax.f32 %v1026_v44, 0.0  ;;  %v1687_v29 = vadd.f32 %v1671_v13, %v1639_v56  ;;  %v1449_v15 = vadd.f32 %v1433_v37, %v1401_v23  ;;  %v1089_v34 = vadd.f32 %v3416_v43, %v1088_v8  ;;  %v2156_v8 = vld [vmem:[%s2549_s9 + $0x30] sm:$0xff] }
 0x1a3   : > { %v1592_v53 = vadd.f32 %v1576_v24, %v1544_v51  ;;  %v1529_v33 = vmul.f32 %v3656_v41, %v2670_v42  ;;  %v1720_v55 = vmul.f32 %v1704_v10, %v2686_v0  ;;  %v1577_v59 = vmul.f32 %v1703_v46, %v2672_v47  ;;  %v2152_v46 = vld [vmem:[%s2549_s9 + $0x20] sm:$0xff]  ;;  %v2155_v24 = vld [vmem:[%s2549_s9 + $0x90] sm:$0xff] }
 0x1a4   : > { %v1058_v35 = vmin.f32 %v1042_v7, 6.0  ;;  %v1735_v12 = vadd.f32 %v1719_v4, %v1687_v29  ;;  %v1497_v31 = vadd.f32 %v1481_v6, %v1449_v15  ;;  %v1130_v30 = vadd.f32 %v2150_v50, %v1089_v34  ;;  %v1803_v22 = vpop.f32.mrf.mxu3  ;;  %v2157_v29 = vld [vmem:[%s2549_s9 + $0x98] sm:$0xff] }
 0x1a5   : > { %v1640_v27 = vadd.f32 %v1624_v54, %v1592_v53  ;;  %v1804_v63 = vadd.f32 %v3416_v43, %v1803_v22  ;;  %v1625_v36 = vmul.f32 %v1609_v38, %v2681_v58  ;;  %v1721_v47 = vmul.f32 %v1705_v28, %v2686_v0  ;;  %v2159_v53 = vld [vmem:[%s2549_s9 + $0xa0] sm:$0xff] }
 0x1a6   : > { %1123 = vmatmul.f32.gmra.mxu1 %v1058_v35  ;;  %v1751_v16 = vadd.f32 %v3247_v3, %v1735_v12  ;;  %v1545_v5 = vadd.f32 %v1529_v33, %v1497_v31  ;;  %1146 = vst [vmem:[%s3448_s14 + $0x18] sm:$0xff] %v1130_v30  ;;  %v2158_v35 = vld [vmem:[%s2549_s9 + $0x38] sm:$0xff]  ;;  %v2160_v30 = vld [vmem:[%s2549_s9 + $0xa8] sm:$0xff] }
 0x1a7   : > { %v1688_v40 = vadd.f32 %v1672_v19, %v1640_v27  ;;  %v1851_v17 = vadd.f32 %v2151_v1, %v1804_v63 }
 0x1a8   : > { %v1767_v42 = vmax.f32 %v1751_v16, 0.0  ;;  %v1593_v25 = vadd.f32 %v1577_v59, %v1545_v5  ;;  %v2161_v16 = vld [vmem:[%s2549_s9 + $0x40] sm:$0xff] }
 0x1a9   : > { %v1091_v61 = vpop.f32.mrf.mxu1  ;;  %v1736_v48 = vadd.f32 %v1720_v55, %v1688_v40  ;;  %2035 = vst [vmem:[%s3448_s14 + $0x80] sm:$0xff] %v1851_v17  ;;  %v2163_v40 = vld [vmem:[%s2549_s9 + $0xb0] sm:$0xff] }
 0x1aa   : > { %v1783_v20 = vmin.f32 %v1767_v42, 6.0  ;;  %v1092_v11 = vadd.f32 %v3416_v43, %v1091_v61  ;;  %v1641_v9 = vadd.f32 %v1625_v36, %v1593_v25  ;;  %v2162_v36 = vld [vmem:[%s2549_s9 + $0x48] sm:$0xff] }
 0x1ab   : > { %v1752_v58 = vadd.f32 %v3247_v3, %v1736_v48 }
 0x1ac   : > { %1841 = vmatmul.f32.gmra.mxu3 %v1783_v20  ;;  %v1131_v14 = vadd.f32 %v2152_v46, %v1092_v11  ;;  %v1689_v41 = vadd.f32 %v1672_v19, %v1641_v9  ;;  %v1806_v13 = vpop.f32.mrf.mxu3  ;;  %v2164_v20 = vld [vmem:[%s2549_s9 + $0xb8] sm:$0xff]  ;;  %v2165_v11 = vld [vmem:[%s2549_s9 + $0x50] sm:$0xff] }
 0x1ad   : > { %v1768_v4 = vmax.f32 %v1752_v58, 0.0  ;;  %v1807_v60 = vadd.f32 %v3416_v43, %v1806_v13 }
 0x1ae   : > { %1147 = vst [vmem:[%s3448_s14 + $0x20] sm:$0xff] %v1131_v14  ;;  %v1737_v62 = vadd.f32 %v1721_v47, %v1689_v41  ;;  %v2166_v41 = vld [vmem:[%s2549_s9 + $0x58] sm:$0xff] }
 0x1af   : > { %v1852_v2 = vadd.f32 %v2153_v52, %v1807_v60  ;;  %v1784_v45 = vmin.f32 %v1768_v4, 6.0  ;;  %v2167_v4 = vld [vmem:[%s2549_s9 + $0xc0] sm:$0xff] }
 0x1b0   : > { %v1753_v49 = vadd.f32 %v3247_v3, %v1737_v62 }
 0x1b1   : > { %v1094_v0 = vpop.f32.mrf.mxu1  ;;  %2036 = vst [vmem:[%s3448_s14 + $0x88] sm:$0xff] %v1852_v2 }
 0x1b2   : > { %v1095_v39 = vadd.f32 %v3416_v43, %v1094_v0  ;;  %v1769_v56 = vmax.f32 %v1753_v49, 0.0 }
 0x1b4   : > { %1844 = vmatmul.f32.gmra.mxu3 %v1784_v45  ;;  %v1132_v57 = vadd.f32 %v2154_v32, %v1095_v39  ;;  %v1809_v44 = vpop.f32.mrf.mxu3  ;;  %v1785_v18 = vmin.f32 %v1769_v56, 6.0  ;;  %v2168_v45 = vld [vmem:[%s2549_s9 + $0x60] sm:$0xff]  ;;  %v2169_v39 = vld [vmem:[%s2549_s9 + $0xc8] sm:$0xff] }
 0x1b5   : > { %v1810_v26 = vadd.f32 %v3416_v43, %v1809_v44 }
 0x1b6   : > { %1148 = vst [vmem:[%s3448_s14 + $0x28] sm:$0xff] %v1132_v57 }
 0x1b7   : > { %v1853_v21 = vadd.f32 %v2155_v24, %v1810_v26  ;;  %v2170_v24 = vld [vmem:[%s2549_s9 + $0x68] sm:$0xff] }
 0x1b9   : > { %2037 = vst [vmem:[%s3448_s14 + $0x90] sm:$0xff] %v1853_v21 }
 0x1bb   : > { %v1097_v3 = vpop.f32.mrf.mxu1 }
 0x1bc   : > { %1847 = vmatmul.f32.gmra.mxu3 %v1785_v18  ;;  %v1098_v23 = vadd.f32 %v3416_v43, %v1097_v3  ;;  %v1812_v37 = vpop.f32.mrf.mxu3  ;;  %v2171_v18 = vld [vmem:[%s2549_s9 + $0xd0] sm:$0xff] }
 0x1bd   : > { %v1813_v6 = vadd.f32 %v3416_v43, %v1812_v37 }
 0x1be   : > { %v1133_v7 = vadd.f32 %v2156_v8, %v1098_v23 }
 0x1bf   : > { %v1854_v51 = vadd.f32 %v2157_v29, %v1813_v6 }
 0x1c0   : > { %1149 = vst [vmem:[%s3448_s14 + $0x30] sm:$0xff] %v1133_v7  ;;  %v2172_v7 = vld [vmem:[%s2549_s9 + $0x70] sm:$0xff] }
 0x1c1   : > { %2038 = vst [vmem:[%s3448_s14 + $0x98] sm:$0xff] %v1854_v51  ;;  %v2173_v51 = vld [vmem:[%s2549_s9 + $0xd8] sm:$0xff] }
 0x1c9   : > { %v1100_v54 = vpop.f32.mrf.mxu1  ;;  %v1815_v15 = vpop.f32.mrf.mxu3 }
 0x1ca   : > { %v1101_v10 = vadd.f32 %v3416_v43, %v1100_v54  ;;  %v1816_v34 = vadd.f32 %v3416_v43, %v1815_v15 }
 0x1cc   : > { %v1134_v12 = vadd.f32 %v2158_v35, %v1101_v10  ;;  %v1855_v19 = vadd.f32 %v2159_v53, %v1816_v34 }
 0x1ce   : > { %1150 = vst [vmem:[%s3448_s14 + $0x38] sm:$0xff] %v1134_v12  ;;  %v2174_v12 = vld [vmem:[%s2549_s9 + $0x78] sm:$0xff] }
 0x1cf   : > { %2039 = vst [vmem:[%s3448_s14 + $0xa0] sm:$0xff] %v1855_v19  ;;  %v2175_v19 = vld [vmem:[%s2549_s9 + $0xe0] sm:$0xff] }
 0x1d4   : > { %v1818_v38 = vpop.f32.mrf.mxu3 }
 0x1d5   : > { %v1103_v31 = vpop.f32.mrf.mxu1  ;;  %v1819_v33 = vadd.f32 %v3416_v43, %v1818_v38 }
 0x1d6   : > { %v1104_v50 = vadd.f32 %v3416_v43, %v1103_v31 }
 0x1d7   : > { %v1856_v22 = vadd.f32 %v2160_v30, %v1819_v33 }
 0x1d8   : > { %v1135_v27 = vadd.f32 %v2161_v16, %v1104_v50  ;;  %v2176_v50 = vld [vmem:[%s2549_s9 + $0xe8] sm:$0xff] }
 0x1d9   : > { %2040 = vst [vmem:[%s3448_s14 + $0xa8] sm:$0xff] %v1856_v22 }
 0x1da   : > { %1151 = vst [vmem:[%s3448_s14 + $0x40] sm:$0xff] %v1135_v27  ;;  %v2177_v27 = vld [vmem:[%s2549_s9 + $0xf0] sm:$0xff] }
 0x1e1   : > { %v1106_v55 = vpop.f32.mrf.mxu1  ;;  %v1821_v63 = vpop.f32.mrf.mxu3 }
 0x1e2   : > { %v1107_v5 = vadd.f32 %v3416_v43, %v1106_v55  ;;  %v1822_v59 = vadd.f32 %v3416_v43, %v1821_v63 }
 0x1e4   : > { %v1136_v42 = vadd.f32 %v2162_v36, %v1107_v5  ;;  %v1857_v28 = vadd.f32 %v2163_v40, %v1822_v59  ;;  %v2178_v59 = vld [vmem:[%s2549_s9 + $0xf8] sm:$0xff] }
 0x1e6   : > { %1152 = vst [vmem:[%s3448_s14 + $0x48] sm:$0xff] %v1136_v42 }
 0x1e7   : > { %2041 = vst [vmem:[%s3448_s14 + $0xb0] sm:$0xff] %v1857_v28 }
 0x1ee   : > { %v1824_v1 = vpop.f32.mrf.mxu3  ;;  %v1109_v17 = vpop.f32.mrf.mxu1 }
 0x1ef   : > { %v1825_v25 = vadd.f32 %v3416_v43, %v1824_v1  ;;  %v1110_v61 = vadd.f32 %v3416_v43, %v1109_v17 }
 0x1f1   : > { %v1858_v48 = vadd.f32 %v2164_v20, %v1825_v25  ;;  %v1137_v9 = vadd.f32 %v2165_v11, %v1110_v61 }
 0x1f3   : > { %2042 = vst [vmem:[%s3448_s14 + $0xb8] sm:$0xff] %v1858_v48 }
 0x1f4   : > { %1153 = vst [vmem:[%s3448_s14 + $0x50] sm:$0xff] %v1137_v9 }
 0x1f9   : > { %v1112_v47 = vpop.f32.mrf.mxu1 }
 0x1fa   : > { %v1113_v58 = vadd.f32 %v3416_v43, %v1112_v47  ;;  %v1827_v46 = vpop.f32.mrf.mxu3 }
 0x1fb   : > { %v1828_v14 = vadd.f32 %v3416_v43, %v1827_v46 }
 0x1fc   : > { %v1138_v13 = vadd.f32 %v2166_v41, %v1113_v58 }
 0x1fd   : > { %v1859_v60 = vadd.f32 %v2167_v4, %v1828_v14 }
 0x1fe   : > { %1154 = vst [vmem:[%s3448_s14 + $0x58] sm:$0xff] %v1138_v13 }
 0x1ff   : > { %2043 = vst [vmem:[%s3448_s14 + $0xc0] sm:$0xff] %v1859_v60 }
 0x205   : > { %v1115_v62 = vpop.f32.mrf.mxu1 }
 0x206   : > { %v1116_v52 = vadd.f32 %v3416_v43, %v1115_v62  ;;  %v1830_v2 = vpop.f32.mrf.mxu3 }
 0x207   : > { %v1831_v0 = vadd.f32 %v3416_v43, %v1830_v2 }
 0x208   : > { %v1139_v49 = vadd.f32 %v2168_v45, %v1116_v52 }
 0x209   : > { %v1860_v32 = vadd.f32 %v2169_v39, %v1831_v0 }
 0x20a   : > { %1155 = vst [vmem:[%s3448_s14 + $0x60] sm:$0xff] %v1139_v49 }
 0x20b   : > { %2044 = vst [vmem:[%s3448_s14 + $0xc8] sm:$0xff] %v1860_v32 }
 0x20e   : > { %v1118_v57 = vpop.f32.mrf.mxu1 }
 0x20f   : > { %v1119_v44 = vadd.f32 %v3416_v43, %v1118_v57 }
 0x210   : > { %v1833_v56 = vpop.f32.mrf.mxu3 }
 0x211   : > { %v1834_v26 = vadd.f32 %v3416_v43, %v1833_v56  ;;  %v1140_v21 = vadd.f32 %v2170_v24, %v1119_v44 }
 0x213   : > { %v1861_v3 = vadd.f32 %v2171_v18, %v1834_v26  ;;  %1156 = vst [vmem:[%s3448_s14 + $0x68] sm:$0xff] %v1140_v21 }
 0x215   : > { %2045 = vst [vmem:[%s3448_s14 + $0xd0] sm:$0xff] %v1861_v3 }
 0x219   : > { %v1121_v23 = vpop.f32.mrf.mxu1 }
 0x21a   : > { %v1122_v37 = vadd.f32 %v3416_v43, %v1121_v23  ;;  %v1836_v6 = vpop.f32.mrf.mxu3 }
 0x21b   : > { %v1837_v8 = vadd.f32 %v3416_v43, %v1836_v6 }
 0x21c   : > { %v1141_v29 = vadd.f32 %v2172_v7, %v1122_v37 }
 0x21d   : > { %v1862_v54 = vadd.f32 %v2173_v51, %v1837_v8 }
 0x21e   : > { %1157 = vst [vmem:[%s3448_s14 + $0x70] sm:$0xff] %v1141_v29 }
 0x21f   : > { %2046 = vst [vmem:[%s3448_s14 + $0xd8] sm:$0xff] %v1862_v54 }
 0x223   : > { %v1124_v10 = vpop.f32.mrf.mxu1 }
 0x224   : > { %v1125_v15 = vadd.f32 %v3416_v43, %v1124_v10  ;;  %v1839_v34 = vpop.f32.mrf.mxu3 }
 0x225   : > { %v1840_v35 = vadd.f32 %v3416_v43, %v1839_v34 }
 0x226   : > { %v1142_v53 = vadd.f32 %v2174_v12, %v1125_v15 }
 0x227   : > { %v1863_v38 = vadd.f32 %v2175_v19, %v1840_v35 }
 0x228   : > { %1158 = vst [vmem:[%s3448_s14 + $0x78] sm:$0xff] %v1142_v53 }
 0x229   : > { %2047 = vst [vmem:[%s3448_s14 + $0xe0] sm:$0xff] %v1863_v38 }
 0x22f   : > { %v1842_v31 = vpop.f32.mrf.mxu3 }
 0x230   : > { %v1843_v33 = vadd.f32 %v3416_v43, %v1842_v31 }
 0x232   : > { %v1864_v30 = vadd.f32 %v2176_v50, %v1843_v33 }
 0x234   : > { %2048 = vst [vmem:[%s3448_s14 + $0xe8] sm:$0xff] %v1864_v30 }
 0x237   : > { %v1845_v22 = vpop.f32.mrf.mxu3 }
 0x238   : > { %v1846_v16 = vadd.f32 %v3416_v43, %v1845_v22 }
 0x23a   : > { %v1865_v55 = vadd.f32 %v2177_v27, %v1846_v16 }
 0x23c   : > { %2049 = vst [vmem:[%s3448_s14 + $0xf0] sm:$0xff] %v1865_v55 }
 0x23f   : > { %v1848_v63 = vpop.f32.mrf.mxu3 }
 0x240   : > { %v1849_v5 = vadd.f32 %v3416_v43, %v1848_v63 }
 0x242   : > { %v1866_v36 = vadd.f32 %v2178_v59, %v1849_v5 }
 0x244   : > { %2050 = vst [vmem:[%s3448_s14 + $0xf8] sm:$0xff] %v1866_v36 }
 0x245   : > { %2326 = shalt.err (!%p2323_p10)
}
 0x246   : > { %s2383_s23 = smov 128   ;;  %s2384_s9 = smov 8  }
 0x247   : > { %2072 = dma.vmem_to_hbm [thread:$0]  (%p2513_p3), %s1898_s19, 4096, %s1900_s11, %s1885_s17, %s2383_s23, %s2383_s23, %s2384_s9  }
 0x248 PF: > { %s1914_s14 = sand.u32 1, %s2361_s24   ;;  %p3657_p12 = scmp.ge.s32.totalorder %s2373_s27, 2 }
 0x249   : > { %s1915_s20 = scalar_lea.sflag [#allocation5], %s1914_s14 }
 0x24a   : > { %p2089_p13 = pnand %p3657_p12, %p2460_p6 }
 0x24c   : > { %p2090_p0 = pneg %p2089_p13 }
 0x24e   : > { %2356 = dma.done.wait (%p2090_p0), %s1915_s20, 4096  }
 0x24f   : > { %2358 = vsyncadd (%p2090_p0), %s1915_s20, 4294963200  ;;  %p22_p5 = scmp.ge.s32.totalorder %s2500_s16, 4   ;;  %s3658_s24 = smov %s2365_s25 }
 0x250   : > { %s3659_s25 = smov %s2369_s26  ;;  %s3660_s26 = smov %s2509_s21 }
 0x251   : > { %s3661_s27 = smov %s2500_s16  ;;  %24 = sbr.rel (!%p22_p5) target bundleno = 9 (0x9), region = 110 }
 0x256   :  { %1921 = vsyncpa [#allocation4], 1 }
 0x257   :  { %1923 = vsyncpa [#allocation4 + $0x1], 1 }
 0x258   :  { %1924 = vsyncpa [#allocation7], 1 }
 0x259   :  { %1925 = vsyncpa [#allocation10], 1 }
 0x25a   :  { %1926 = vsyncpa [#allocation5], 1 }
 0x25b   :  { %1928 = vsyncpa [#allocation5 + $0x1], 1 }

</bundles_post_ra>
